<compile_context>
chip_gen: v7x
topology: tpu7x:2x2x1
jax: 0.10.0
libtpu: 0.0.40
codegen_flags: <defaults>
</compile_context>

<pallas_src>
import math
from functools import partial

import jax
import jax.numpy as jnp
from jax import lax
from jax.experimental import pallas as pl
from jax.experimental.pallas import tpu as pltpu


def _xca_kernel(temp_ref, x_ref, wpt_ref, out_ref, *, num_heads, head_dim, eps):
    # temp_ref : (1, H)      per-head temperature
    # x_ref    : (1, N, 3C)  packed qkv for one batch element (C = H * Dh)
    # wpt_ref  : (C, C)      projection weight, already transposed (W^T)
    # out_ref  : (1, N, C)
    C = num_heads * head_dim
    N = x_ref.shape[1]

    temp = temp_ref[...].astype(jnp.float32)                       # (1, H)

    acc = jnp.zeros((N, C), jnp.float32)
    for h in range(num_heads):
        c0 = h * head_dim
        # Per-head q/k/v in (N, Dh) layout, read straight from the VMEM ref so only
        # one head's window is live at a time.
        q = x_ref[0, :, c0:c0 + head_dim].astype(jnp.float32)
        k = x_ref[0, :, C + c0:C + c0 + head_dim].astype(jnp.float32)
        v = x_ref[0, :, 2 * C + c0:2 * C + c0 + head_dim].astype(jnp.float32)

        # torch F.normalize(dim=-1) on the (Dh, N)-transposed q/k == L2-normalize each
        # column (over tokens) in this layout; denominator is clamped at eps.
        q_n = q * (1.0 / jnp.maximum(jnp.sqrt(jnp.sum(q * q, axis=0, keepdims=True)), eps))
        k_n = k * (1.0 / jnp.maximum(jnp.sqrt(jnp.sum(k * k, axis=0, keepdims=True)), eps))

        # Cross-covariance: attn[d, e] = sum_n q_n[n, d] * k_n[n, e]   -> (Dh, Dh)
        attn = lax.dot_general(q_n, k_n, (((0,), (0,)), ((), ())),
                               preferred_element_type=jnp.float32)
        attn = attn * temp[0:1, h:h + 1]                             # per-head temperature

        # Numerically stable softmax over the last axis.
        attn = attn - jnp.max(attn, axis=-1, keepdims=True)
        attn = jnp.exp(attn)
        attn = attn / jnp.sum(attn, axis=-1, keepdims=True)
        # TODO(synk): attn_drop / proj_drop omitted (p=0.0 defaults; inference path).

        # y[n, d] = sum_e v[n, e] * attn[d, e]                        -> (N, Dh)
        y = lax.dot_general(v, attn, (((1,), (1,)), ((), ())),
                            preferred_element_type=jnp.float32)

        # Fused head-concat + projection: out += y_h @ W^T[h*Dh:(h+1)*Dh, :]
        w_h = wpt_ref[c0:c0 + head_dim, :].astype(jnp.float32)        # (Dh, C)
        acc = acc + jnp.dot(y, w_h, preferred_element_type=jnp.float32)

    out_ref[0] = acc.astype(out_ref.dtype)


def xca_forward(x, params):
    """x: (B, N, 3*C).  params: {"temperature": (H,1,1), "proj_w": (C, C) torch Linear weight}."""
    B, N, C3 = x.shape
    assert C3 % 3 == 0
    C = C3 // 3
    num_heads = params["temperature"].shape[0]
    assert C % num_heads == 0
    head_dim = C // num_heads

    temp = params["temperature"].reshape(1, num_heads)               # (1, H), tiny
    wpt = jnp.transpose(params["proj_w"])                            # (C, C) = W^T, tiny

    kernel = partial(_xca_kernel, num_heads=num_heads, head_dim=head_dim, eps=1e-12)

    # VMEM budget derived from the real block footprint (input + output + weights),
    # with headroom for double-buffering and in-kernel f32 temporaries.
    bytes_per_step = 4 * (N * C3 + N * C + C * C + num_heads)
    vmem_limit = int(min(64 * 2**20, max(32 * 2**20, 4 * bytes_per_step)))

    out = pl.pallas_call(
        kernel,
        out_shape=jax.ShapeDtypeStruct((B, N, C), x.dtype),
        grid_spec=pltpu.PrefetchScalarGridSpec(
            num_scalar_prefetch=0,
            grid=(B,),
            in_specs=[
                pl.BlockSpec((1, num_heads), lambda b: (0, 0)),      # temperature
                pl.BlockSpec((1, N, C3), lambda b: (b, 0, 0)),       # packed qkv
                pl.BlockSpec((C, C), lambda b: (0, 0)),              # proj W^T
            ],
            out_specs=pl.BlockSpec((1, N, C), lambda b: (b, 0, 0)),
        ),
        compiler_params=pltpu.CompilerParams(
            dimension_semantics=("parallel",),
            vmem_limit_bytes=vmem_limit,
        ),
    )(temp, x, wpt)
    return out


# ---------------- pure-JAX reference (for correctness check) ----------------
def xca_reference(x, params):
    B, N, C3 = x.shape
    C = C3 // 3
    H = params["temperature"].shape[0]
    Dh = C // H

    qkv = jnp.transpose(x.reshape(B, N, 3, H, Dh), (2, 0, 3, 1, 4))   # (3, B, H, N, Dh)
    q, k, v = qkv[0], qkv[1], qkv[2]
    q = jnp.swapaxes(q, -2, -1)                                       # (B, H, Dh, N)
    k = jnp.swapaxes(k, -2, -1)
    v = jnp.swapaxes(v, -2, -1)

    def l2norm(a):
        n = jnp.sqrt(jnp.sum(a * a, axis=-1, keepdims=True))
        return a / jnp.maximum(n, 1e-12)

    q = l2norm(q)
    k = l2norm(k)
    attn = jnp.einsum("bhdn,bhen->bhde", q, k, precision=lax.Precision.HIGHEST)
    attn = attn * params["temperature"][None]                          # (1,H,1,1) broadcast
    attn = jax.nn.softmax(attn, axis=-1)
    out = jnp.einsum("bhde,bhen->bhdn", attn, v, precision=lax.Precision.HIGHEST)
    out = jnp.transpose(out, (0, 3, 1, 2)).reshape(B, N, C)            # (B, N, C)
    out = jnp.dot(out, params["proj_w"].T, precision=lax.Precision.HIGHEST)
    return out


if __name__ == "__main__":
    B, N, num_heads, C = 2, 64, 4, 32            # input dim = 3*C = 96, head_dim = 8
    key = jax.random.PRNGKey(0)
    k_x, k_w, k_t = jax.random.split(key, 3)

    x = jax.random.normal(k_x, (B, N, 3 * C), jnp.float32)
    bound = 1.0 / math.sqrt(C)
    params = {
        "temperature": jax.random.uniform(k_t, (num_heads, 1, 1), jnp.float32, 0.5, 1.5),
        "proj_w": jax.random.uniform(k_w, (C, C), jnp.float32, -bound, bound),
    }

    out = xca_forward(x, params)
    out = jax.block_until_ready(out)

    ref = xca_reference(x, params)
    assert out.shape == (B, N, C)
    err = float(jnp.max(jnp.abs(out - ref)))
    assert err < 2e-3, f"mismatch vs reference: max abs err {err}"
    print("KERNEL_OK")
</pallas_src>

<mosaic_0001>
module attributes {stable_mosaic.version = 11 : i64} {
  func.func @_xca_kernel(%arg0: i32, %arg1: memref<1x4xf32, #tpu.memory_space<vmem>>, %arg2: memref<1x64x96xf32, #tpu.memory_space<vmem>>, %arg3: memref<32x32xf32, #tpu.memory_space<vmem>>, %arg4: memref<1x64x32xf32, #tpu.memory_space<vmem>>) attributes {dimension_semantics = [#tpu.dimension_semantics<parallel>], iteration_bounds = array<i64: 2>, scalar_prefetch = 0 : i64, scratch_operands = 0 : i64, tpu.core_type = #tpu.core_type<tc>, window_params = [{pipeline_mode = #tpu.pipeline_mode<synchronous>, transform_indices = @transform_0, window_bounds = array<i64: 1, 4>}, {transform_indices = @transform_1, window_bounds = array<i64: 1, 64, 96>}, {pipeline_mode = #tpu.pipeline_mode<synchronous>, transform_indices = @transform_2, window_bounds = array<i64: 32, 32>}, {transform_indices = @transform_3, window_bounds = array<i64: 1, 64, 32>}]} {
    %c0 = arith.constant 0 : index
    %c0_0 = arith.constant 0 : index
    %0 = vector.load %arg1[%c0, %c0_0] : memref<1x4xf32, #tpu.memory_space<vmem>>, vector<1x4xf32>
    %cst = arith.constant 0.000000e+00 : f32
    %1 = vector.broadcast %cst : f32 to vector<64x32xf32>
    %c0_1 = arith.constant 0 : index
    %c0_2 = arith.constant 0 : index
    %c0_3 = arith.constant 0 : index
    %2 = vector.load %arg2[%c0_1, %c0_2, %c0_3] : memref<1x64x96xf32, #tpu.memory_space<vmem>>, vector<1x64x8xf32>
    %3 = vector.shape_cast %2 : vector<1x64x8xf32> to vector<64x8xf32>
    %c0_4 = arith.constant 0 : index
    %c0_5 = arith.constant 0 : index
    %c32 = arith.constant 32 : index
    %4 = vector.load %arg2[%c0_4, %c0_5, %c32] : memref<1x64x96xf32, #tpu.memory_space<vmem>>, vector<1x64x8xf32>
    %5 = vector.shape_cast %4 : vector<1x64x8xf32> to vector<64x8xf32>
    %c0_6 = arith.constant 0 : index
    %c0_7 = arith.constant 0 : index
    %c64 = arith.constant 64 : index
    %6 = vector.load %arg2[%c0_6, %c0_7, %c64] : memref<1x64x96xf32, #tpu.memory_space<vmem>>, vector<1x64x8xf32>
    %7 = vector.shape_cast %6 : vector<1x64x8xf32> to vector<64x8xf32>
    %8 = arith.mulf %3, %3 : vector<64x8xf32>
    %cst_8 = arith.constant dense<0.000000e+00> : vector<8xf32>
    %9 = vector.multi_reduction <add>, %8, %cst_8 [0] : vector<64x8xf32> to vector<8xf32>
    %10 = vector.shape_cast %9 : vector<8xf32> to vector<1x8xf32>
    %11 = math.sqrt %10 : vector<1x8xf32>
    %cst_9 = arith.constant 9.99999996E-13 : f32
    %12 = vector.broadcast %cst_9 : f32 to vector<1x8xf32>
    %13 = arith.maximumf %11, %12 : vector<1x8xf32>
    %cst_10 = arith.constant 1.000000e+00 : f32
    %14 = vector.broadcast %cst_10 : f32 to vector<1x8xf32>
    %15 = arith.divf %14, %13 : vector<1x8xf32>
    %16 = vector.broadcast %15 : vector<1x8xf32> to vector<64x8xf32>
    %17 = arith.mulf %3, %16 : vector<64x8xf32>
    %18 = arith.mulf %5, %5 : vector<64x8xf32>
    %cst_11 = arith.constant dense<0.000000e+00> : vector<8xf32>
    %19 = vector.multi_reduction <add>, %18, %cst_11 [0] : vector<64x8xf32> to vector<8xf32>
    %20 = vector.shape_cast %19 : vector<8xf32> to vector<1x8xf32>
    %21 = math.sqrt %20 : vector<1x8xf32>
    %cst_12 = arith.constant 9.99999996E-13 : f32
    %22 = vector.broadcast %cst_12 : f32 to vector<1x8xf32>
    %23 = arith.maximumf %21, %22 : vector<1x8xf32>
    %cst_13 = arith.constant 1.000000e+00 : f32
    %24 = vector.broadcast %cst_13 : f32 to vector<1x8xf32>
    %25 = arith.divf %24, %23 : vector<1x8xf32>
    %26 = vector.broadcast %25 : vector<1x8xf32> to vector<64x8xf32>
    %27 = arith.mulf %5, %26 : vector<64x8xf32>
    %cst_14 = arith.constant dense<0.000000e+00> : vector<8x8xf32>
    %28 = tpu.matmul %17, %27, %cst_14 {dimension_numbers = #tpu.dot_dimension_numbers<[0], [0], [1], [1], [0, 1, 1, 1], [], []>} : vector<64x8xf32>, vector<64x8xf32>, vector<8x8xf32> -> vector<8x8xf32>
    %29 = vector.extract_strided_slice %0 {offsets = [0, 0], sizes = [1, 1], strides = [1, 1]} : vector<1x4xf32> to vector<1x1xf32>
    %30 = vector.broadcast %29 : vector<1x1xf32> to vector<8x8xf32>
    %31 = arith.mulf %28, %30 : vector<8x8xf32>
    %cst_15 = arith.constant dense<0xFF800000> : vector<8xf32>
    %32 = vector.multi_reduction <maximumf>, %31, %cst_15 [1] : vector<8x8xf32> to vector<8xf32>
    %33 = vector.shape_cast %32 : vector<8xf32> to vector<8x1xf32>
    %34 = vector.broadcast %33 : vector<8x1xf32> to vector<8x8xf32>
    %35 = arith.subf %31, %34 : vector<8x8xf32>
    %36 = math.exp %35 : vector<8x8xf32>
    %cst_16 = arith.constant dense<0.000000e+00> : vector<8xf32>
    %37 = vector.multi_reduction <add>, %36, %cst_16 [1] : vector<8x8xf32> to vector<8xf32>
    %38 = vector.shape_cast %37 : vector<8xf32> to vector<8x1xf32>
    %39 = vector.broadcast %38 : vector<8x1xf32> to vector<8x8xf32>
    %40 = arith.divf %36, %39 : vector<8x8xf32>
    %cst_17 = arith.constant dense<0.000000e+00> : vector<64x8xf32>
    %41 = tpu.matmul %7, %40, %cst_17 {dimension_numbers = #tpu.dot_dimension_numbers<[1], [1], [0], [0], [0, 0, 1, 0], [], []>} : vector<64x8xf32>, vector<8x8xf32>, vector<64x8xf32> -> vector<64x8xf32>
    %c0_18 = arith.constant 0 : index
    %c0_19 = arith.constant 0 : index
    %42 = vector.load %arg3[%c0_18, %c0_19] : memref<32x32xf32, #tpu.memory_space<vmem>>, vector<8x32xf32>
    %cst_20 = arith.constant dense<0.000000e+00> : vector<64x32xf32>
    %43 = tpu.matmul %41, %42, %cst_20 {dimension_numbers = #tpu.dot_dimension_numbers<[1], [0], [0], [1], [0, 0, 1, 1], [], []>} : vector<64x8xf32>, vector<8x32xf32>, vector<64x32xf32> -> vector<64x32xf32>
    %44 = arith.addf %1, %43 : vector<64x32xf32>
    %c0_21 = arith.constant 0 : index
    %c0_22 = arith.constant 0 : index
    %c8 = arith.constant 8 : index
    %45 = vector.load %arg2[%c0_21, %c0_22, %c8] : memref<1x64x96xf32, #tpu.memory_space<vmem>>, vector<1x64x8xf32>
    %46 = vector.shape_cast %45 : vector<1x64x8xf32> to vector<64x8xf32>
    %c0_23 = arith.constant 0 : index
    %c0_24 = arith.constant 0 : index
    %c40 = arith.constant 40 : index
    %47 = vector.load %arg2[%c0_23, %c0_24, %c40] : memref<1x64x96xf32, #tpu.memory_space<vmem>>, vector<1x64x8xf32>
    %48 = vector.shape_cast %47 : vector<1x64x8xf32> to vector<64x8xf32>
    %c0_25 = arith.constant 0 : index
    %c0_26 = arith.constant 0 : index
    %c72 = arith.constant 72 : index
    %49 = vector.load %arg2[%c0_25, %c0_26, %c72] : memref<1x64x96xf32, #tpu.memory_space<vmem>>, vector<1x64x8xf32>
    %50 = vector.shape_cast %49 : vector<1x64x8xf32> to vector<64x8xf32>
    %51 = arith.mulf %46, %46 : vector<64x8xf32>
    %cst_27 = arith.constant dense<0.000000e+00> : vector<8xf32>
    %52 = vector.multi_reduction <add>, %51, %cst_27 [0] : vector<64x8xf32> to vector<8xf32>
    %53 = vector.shape_cast %52 : vector<8xf32> to vector<1x8xf32>
    %54 = math.sqrt %53 : vector<1x8xf32>
    %cst_28 = arith.constant 9.99999996E-13 : f32
    %55 = vector.broadcast %cst_28 : f32 to vector<1x8xf32>
    %56 = arith.maximumf %54, %55 : vector<1x8xf32>
    %cst_29 = arith.constant 1.000000e+00 : f32
    %57 = vector.broadcast %cst_29 : f32 to vector<1x8xf32>
    %58 = arith.divf %57, %56 : vector<1x8xf32>
    %59 = vector.broadcast %58 : vector<1x8xf32> to vector<64x8xf32>
    %60 = arith.mulf %46, %59 : vector<64x8xf32>
    %61 = arith.mulf %48, %48 : vector<64x8xf32>
    %cst_30 = arith.constant dense<0.000000e+00> : vector<8xf32>
    %62 = vector.multi_reduction <add>, %61, %cst_30 [0] : vector<64x8xf32> to vector<8xf32>
    %63 = vector.shape_cast %62 : vector<8xf32> to vector<1x8xf32>
    %64 = math.sqrt %63 : vector<1x8xf32>
    %cst_31 = arith.constant 9.99999996E-13 : f32
    %65 = vector.broadcast %cst_31 : f32 to vector<1x8xf32>
    %66 = arith.maximumf %64, %65 : vector<1x8xf32>
    %cst_32 = arith.constant 1.000000e+00 : f32
    %67 = vector.broadcast %cst_32 : f32 to vector<1x8xf32>
    %68 = arith.divf %67, %66 : vector<1x8xf32>
    %69 = vector.broadcast %68 : vector<1x8xf32> to vector<64x8xf32>
    %70 = arith.mulf %48, %69 : vector<64x8xf32>
    %cst_33 = arith.constant dense<0.000000e+00> : vector<8x8xf32>
    %71 = tpu.matmul %60, %70, %cst_33 {dimension_numbers = #tpu.dot_dimension_numbers<[0], [0], [1], [1], [0, 1, 1, 1], [], []>} : vector<64x8xf32>, vector<64x8xf32>, vector<8x8xf32> -> vector<8x8xf32>
    %72 = vector.extract_strided_slice %0 {offsets = [0, 1], sizes = [1, 1], strides = [1, 1]} : vector<1x4xf32> to vector<1x1xf32>
    %73 = vector.broadcast %72 : vector<1x1xf32> to vector<8x8xf32>
    %74 = arith.mulf %71, %73 : vector<8x8xf32>
    %cst_34 = arith.constant dense<0xFF800000> : vector<8xf32>
    %75 = vector.multi_reduction <maximumf>, %74, %cst_34 [1] : vector<8x8xf32> to vector<8xf32>
    %76 = vector.shape_cast %75 : vector<8xf32> to vector<8x1xf32>
    %77 = vector.broadcast %76 : vector<8x1xf32> to vector<8x8xf32>
    %78 = arith.subf %74, %77 : vector<8x8xf32>
    %79 = math.exp %78 : vector<8x8xf32>
    %cst_35 = arith.constant dense<0.000000e+00> : vector<8xf32>
    %80 = vector.multi_reduction <add>, %79, %cst_35 [1] : vector<8x8xf32> to vector<8xf32>
    %81 = vector.shape_cast %80 : vector<8xf32> to vector<8x1xf32>
    %82 = vector.broadcast %81 : vector<8x1xf32> to vector<8x8xf32>
    %83 = arith.divf %79, %82 : vector<8x8xf32>
    %cst_36 = arith.constant dense<0.000000e+00> : vector<64x8xf32>
    %84 = tpu.matmul %50, %83, %cst_36 {dimension_numbers = #tpu.dot_dimension_numbers<[1], [1], [0], [0], [0, 0, 1, 0], [], []>} : vector<64x8xf32>, vector<8x8xf32>, vector<64x8xf32> -> vector<64x8xf32>
    %c8_37 = arith.constant 8 : index
    %c0_38 = arith.constant 0 : index
    %85 = vector.load %arg3[%c8_37, %c0_38] : memref<32x32xf32, #tpu.memory_space<vmem>>, vector<8x32xf32>
    %cst_39 = arith.constant dense<0.000000e+00> : vector<64x32xf32>
    %86 = tpu.matmul %84, %85, %cst_39 {dimension_numbers = #tpu.dot_dimension_numbers<[1], [0], [0], [1], [0, 0, 1, 1], [], []>} : vector<64x8xf32>, vector<8x32xf32>, vector<64x32xf32> -> vector<64x32xf32>
    %87 = arith.addf %44, %86 : vector<64x32xf32>
    %c0_40 = arith.constant 0 : index
    %c0_41 = arith.constant 0 : index
    %c16 = arith.constant 16 : index
    %88 = vector.load %arg2[%c0_40, %c0_41, %c16] : memref<1x64x96xf32, #tpu.memory_space<vmem>>, vector<1x64x8xf32>
    %89 = vector.shape_cast %88 : vector<1x64x8xf32> to vector<64x8xf32>
    %c0_42 = arith.constant 0 : index
    %c0_43 = arith.constant 0 : index
    %c48 = arith.constant 48 : index
    %90 = vector.load %arg2[%c0_42, %c0_43, %c48] : memref<1x64x96xf32, #tpu.memory_space<vmem>>, vector<1x64x8xf32>
    %91 = vector.shape_cast %90 : vector<1x64x8xf32> to vector<64x8xf32>
    %c0_44 = arith.constant 0 : index
    %c0_45 = arith.constant 0 : index
    %c80 = arith.constant 80 : index
    %92 = vector.load %arg2[%c0_44, %c0_45, %c80] : memref<1x64x96xf32, #tpu.memory_space<vmem>>, vector<1x64x8xf32>
    %93 = vector.shape_cast %92 : vector<1x64x8xf32> to vector<64x8xf32>
    %94 = arith.mulf %89, %89 : vector<64x8xf32>
    %cst_46 = arith.constant dense<0.000000e+00> : vector<8xf32>
    %95 = vector.multi_reduction <add>, %94, %cst_46 [0] : vector<64x8xf32> to vector<8xf32>
    %96 = vector.shape_cast %95 : vector<8xf32> to vector<1x8xf32>
    %97 = math.sqrt %96 : vector<1x8xf32>
    %cst_47 = arith.constant 9.99999996E-13 : f32
    %98 = vector.broadcast %cst_47 : f32 to vector<1x8xf32>
    %99 = arith.maximumf %97, %98 : vector<1x8xf32>
    %cst_48 = arith.constant 1.000000e+00 : f32
    %100 = vector.broadcast %cst_48 : f32 to vector<1x8xf32>
    %101 = arith.divf %100, %99 : vector<1x8xf32>
    %102 = vector.broadcast %101 : vector<1x8xf32> to vector<64x8xf32>
    %103 = arith.mulf %89, %102 : vector<64x8xf32>
    %104 = arith.mulf %91, %91 : vector<64x8xf32>
    %cst_49 = arith.constant dense<0.000000e+00> : vector<8xf32>
    %105 = vector.multi_reduction <add>, %104, %cst_49 [0] : vector<64x8xf32> to vector<8xf32>
    %106 = vector.shape_cast %105 : vector<8xf32> to vector<1x8xf32>
    %107 = math.sqrt %106 : vector<1x8xf32>
    %cst_50 = arith.constant 9.99999996E-13 : f32
    %108 = vector.broadcast %cst_50 : f32 to vector<1x8xf32>
    %109 = arith.maximumf %107, %108 : vector<1x8xf32>
    %cst_51 = arith.constant 1.000000e+00 : f32
    %110 = vector.broadcast %cst_51 : f32 to vector<1x8xf32>
    %111 = arith.divf %110, %109 : vector<1x8xf32>
    %112 = vector.broadcast %111 : vector<1x8xf32> to vector<64x8xf32>
    %113 = arith.mulf %91, %112 : vector<64x8xf32>
    %cst_52 = arith.constant dense<0.000000e+00> : vector<8x8xf32>
    %114 = tpu.matmul %103, %113, %cst_52 {dimension_numbers = #tpu.dot_dimension_numbers<[0], [0], [1], [1], [0, 1, 1, 1], [], []>} : vector<64x8xf32>, vector<64x8xf32>, vector<8x8xf32> -> vector<8x8xf32>
    %115 = vector.extract_strided_slice %0 {offsets = [0, 2], sizes = [1, 1], strides = [1, 1]} : vector<1x4xf32> to vector<1x1xf32>
    %116 = vector.broadcast %115 : vector<1x1xf32> to vector<8x8xf32>
    %117 = arith.mulf %114, %116 : vector<8x8xf32>
    %cst_53 = arith.constant dense<0xFF800000> : vector<8xf32>
    %118 = vector.multi_reduction <maximumf>, %117, %cst_53 [1] : vector<8x8xf32> to vector<8xf32>
    %119 = vector.shape_cast %118 : vector<8xf32> to vector<8x1xf32>
    %120 = vector.broadcast %119 : vector<8x1xf32> to vector<8x8xf32>
    %121 = arith.subf %117, %120 : vector<8x8xf32>
    %122 = math.exp %121 : vector<8x8xf32>
    %cst_54 = arith.constant dense<0.000000e+00> : vector<8xf32>
    %123 = vector.multi_reduction <add>, %122, %cst_54 [1] : vector<8x8xf32> to vector<8xf32>
    %124 = vector.shape_cast %123 : vector<8xf32> to vector<8x1xf32>
    %125 = vector.broadcast %124 : vector<8x1xf32> to vector<8x8xf32>
    %126 = arith.divf %122, %125 : vector<8x8xf32>
    %cst_55 = arith.constant dense<0.000000e+00> : vector<64x8xf32>
    %127 = tpu.matmul %93, %126, %cst_55 {dimension_numbers = #tpu.dot_dimension_numbers<[1], [1], [0], [0], [0, 0, 1, 0], [], []>} : vector<64x8xf32>, vector<8x8xf32>, vector<64x8xf32> -> vector<64x8xf32>
    %c16_56 = arith.constant 16 : index
    %c0_57 = arith.constant 0 : index
    %128 = vector.load %arg3[%c16_56, %c0_57] : memref<32x32xf32, #tpu.memory_space<vmem>>, vector<8x32xf32>
    %cst_58 = arith.constant dense<0.000000e+00> : vector<64x32xf32>
    %129 = tpu.matmul %127, %128, %cst_58 {dimension_numbers = #tpu.dot_dimension_numbers<[1], [0], [0], [1], [0, 0, 1, 1], [], []>} : vector<64x8xf32>, vector<8x32xf32>, vector<64x32xf32> -> vector<64x32xf32>
    %130 = arith.addf %87, %129 : vector<64x32xf32>
    %c0_59 = arith.constant 0 : index
    %c0_60 = arith.constant 0 : index
    %c24 = arith.constant 24 : index
    %131 = vector.load %arg2[%c0_59, %c0_60, %c24] : memref<1x64x96xf32, #tpu.memory_space<vmem>>, vector<1x64x8xf32>
    %132 = vector.shape_cast %131 : vector<1x64x8xf32> to vector<64x8xf32>
    %c0_61 = arith.constant 0 : index
    %c0_62 = arith.constant 0 : index
    %c56 = arith.constant 56 : index
    %133 = vector.load %arg2[%c0_61, %c0_62, %c56] : memref<1x64x96xf32, #tpu.memory_space<vmem>>, vector<1x64x8xf32>
    %134 = vector.shape_cast %133 : vector<1x64x8xf32> to vector<64x8xf32>
    %c0_63 = arith.constant 0 : index
    %c0_64 = arith.constant 0 : index
    %c88 = arith.constant 88 : index
    %135 = vector.load %arg2[%c0_63, %c0_64, %c88] : memref<1x64x96xf32, #tpu.memory_space<vmem>>, vector<1x64x8xf32>
    %136 = vector.shape_cast %135 : vector<1x64x8xf32> to vector<64x8xf32>
    %137 = arith.mulf %132, %132 : vector<64x8xf32>
    %cst_65 = arith.constant dense<0.000000e+00> : vector<8xf32>
    %138 = vector.multi_reduction <add>, %137, %cst_65 [0] : vector<64x8xf32> to vector<8xf32>
    %139 = vector.shape_cast %138 : vector<8xf32> to vector<1x8xf32>
    %140 = math.sqrt %139 : vector<1x8xf32>
    %cst_66 = arith.constant 9.99999996E-13 : f32
    %141 = vector.broadcast %cst_66 : f32 to vector<1x8xf32>
    %142 = arith.maximumf %140, %141 : vector<1x8xf32>
    %cst_67 = arith.constant 1.000000e+00 : f32
    %143 = vector.broadcast %cst_67 : f32 to vector<1x8xf32>
    %144 = arith.divf %143, %142 : vector<1x8xf32>
    %145 = vector.broadcast %144 : vector<1x8xf32> to vector<64x8xf32>
    %146 = arith.mulf %132, %145 : vector<64x8xf32>
    %147 = arith.mulf %134, %134 : vector<64x8xf32>
    %cst_68 = arith.constant dense<0.000000e+00> : vector<8xf32>
    %148 = vector.multi_reduction <add>, %147, %cst_68 [0] : vector<64x8xf32> to vector<8xf32>
    %149 = vector.shape_cast %148 : vector<8xf32> to vector<1x8xf32>
    %150 = math.sqrt %149 : vector<1x8xf32>
    %cst_69 = arith.constant 9.99999996E-13 : f32
    %151 = vector.broadcast %cst_69 : f32 to vector<1x8xf32>
    %152 = arith.maximumf %150, %151 : vector<1x8xf32>
    %cst_70 = arith.constant 1.000000e+00 : f32
    %153 = vector.broadcast %cst_70 : f32 to vector<1x8xf32>
    %154 = arith.divf %153, %152 : vector<1x8xf32>
    %155 = vector.broadcast %154 : vector<1x8xf32> to vector<64x8xf32>
    %156 = arith.mulf %134, %155 : vector<64x8xf32>
    %cst_71 = arith.constant dense<0.000000e+00> : vector<8x8xf32>
    %157 = tpu.matmul %146, %156, %cst_71 {dimension_numbers = #tpu.dot_dimension_numbers<[0], [0], [1], [1], [0, 1, 1, 1], [], []>} : vector<64x8xf32>, vector<64x8xf32>, vector<8x8xf32> -> vector<8x8xf32>
    %158 = vector.extract_strided_slice %0 {offsets = [0, 3], sizes = [1, 1], strides = [1, 1]} : vector<1x4xf32> to vector<1x1xf32>
    %159 = vector.broadcast %158 : vector<1x1xf32> to vector<8x8xf32>
    %160 = arith.mulf %157, %159 : vector<8x8xf32>
    %cst_72 = arith.constant dense<0xFF800000> : vector<8xf32>
    %161 = vector.multi_reduction <maximumf>, %160, %cst_72 [1] : vector<8x8xf32> to vector<8xf32>
    %162 = vector.shape_cast %161 : vector<8xf32> to vector<8x1xf32>
    %163 = vector.broadcast %162 : vector<8x1xf32> to vector<8x8xf32>
    %164 = arith.subf %160, %163 : vector<8x8xf32>
    %165 = math.exp %164 : vector<8x8xf32>
    %cst_73 = arith.constant dense<0.000000e+00> : vector<8xf32>
    %166 = vector.multi_reduction <add>, %165, %cst_73 [1] : vector<8x8xf32> to vector<8xf32>
    %167 = vector.shape_cast %166 : vector<8xf32> to vector<8x1xf32>
    %168 = vector.broadcast %167 : vector<8x1xf32> to vector<8x8xf32>
    %169 = arith.divf %165, %168 : vector<8x8xf32>
    %cst_74 = arith.constant dense<0.000000e+00> : vector<64x8xf32>
    %170 = tpu.matmul %136, %169, %cst_74 {dimension_numbers = #tpu.dot_dimension_numbers<[1], [1], [0], [0], [0, 0, 1, 0], [], []>} : vector<64x8xf32>, vector<8x8xf32>, vector<64x8xf32> -> vector<64x8xf32>
    %c24_75 = arith.constant 24 : index
    %c0_76 = arith.constant 0 : index
    %171 = vector.load %arg3[%c24_75, %c0_76] : memref<32x32xf32, #tpu.memory_space<vmem>>, vector<8x32xf32>
    %cst_77 = arith.constant dense<0.000000e+00> : vector<64x32xf32>
    %172 = tpu.matmul %170, %171, %cst_77 {dimension_numbers = #tpu.dot_dimension_numbers<[1], [0], [0], [1], [0, 0, 1, 1], [], []>} : vector<64x8xf32>, vector<8x32xf32>, vector<64x32xf32> -> vector<64x32xf32>
    %173 = arith.addf %130, %172 : vector<64x32xf32>
    %c0_78 = arith.constant 0 : index
    %c0_79 = arith.constant 0 : index
    %c0_80 = arith.constant 0 : index
    %174 = vector.load %arg4[%c0_78, %c0_79, %c0_80] : memref<1x64x32xf32, #tpu.memory_space<vmem>>, vector<1x64x32xf32>
    %175 = vector.shape_cast %174 : vector<1x64x32xf32> to vector<64x32xf32>
    %176 = vector.shape_cast %173 : vector<64x32xf32> to vector<1x64x32xf32>
    tpu.vector_store %arg4[%c0_78, %c0_79, %c0_80], %176 {strides = array<i32>} : memref<1x64x32xf32, #tpu.memory_space<vmem>>, vector<1x64x32xf32>,
    return
  }
  func.func @transform_0(%arg0: i32) -> (i32, i32) {
    %c0_i32 = arith.constant 0 : i32
    %c0_i32_0 = arith.constant 0 : i32
    %c0_i32_1 = arith.constant 0 : i32
    return %c0_i32, %c0_i32_0 : i32, i32
  }
  func.func @transform_1(%arg0: i32) -> (i32, i32, i32) {
    %c0_i32 = arith.constant 0 : i32
    %c0_i32_0 = arith.constant 0 : i32
    %c0_i32_1 = arith.constant 0 : i32
    return %arg0, %c0_i32, %c0_i32_0 : i32, i32, i32
  }
  func.func @transform_2(%arg0: i32) -> (i32, i32) {
    %c0_i32 = arith.constant 0 : i32
    %c0_i32_0 = arith.constant 0 : i32
    %c0_i32_1 = arith.constant 0 : i32
    return %c0_i32, %c0_i32_0 : i32, i32
  }
  func.func @transform_3(%arg0: i32) -> (i32, i32, i32) {
    %c0_i32 = arith.constant 0 : i32
    %c0_i32_0 = arith.constant 0 : i32
    %c0_i32_1 = arith.constant 0 : i32
    return %arg0, %c0_i32, %c0_i32_0 : i32, i32, i32
  }
}

</mosaic_0001>

<bundles_post_ra>
// kernel: tpu_custom_call.1
= control target key start
LH: loop header
LB: loop body
LE: loop exit
PB: predicated region body
PF: predicated region fallthrough
CT: control target
= control target key end

     0   :  { %8 = vsyncpa [#allocation3], 0  ;;  %s4041_s0 = inlined_call_operand.hbm [shape: f32[1,4], index: 0, kind: input, shape index: {}]   ;;  %s4042_s1 = inlined_call_operand.hbm [shape: f32[2,64,96], index: 1, kind: input, shape index: {}]   ;;  %s4043_s2 = inlined_call_operand.hbm [shape: f32[32,32], index: 2, kind: input, shape index: {}]   ;;  %s4044_s3 = inlined_call_operand.vmem [shape: f32[2,64,32], index: 3, kind: output, shape index: {}]  }
   0x1   :  { %9 = vsyncpa [#allocation5], 0 }
   0x2   :  { %11 = vsyncpa [#allocation5 + $0x1], 0  ;;  %s3325_s12 = smov 0   ;;  %s3327_s13 = smov 0  }
   0x3   :  { %s3329_s14 = smov 0   ;;  %s3331_s15 = smov 0  }
   0x4 LB: > { %s3344_s16 = sadd.s32 4294967295, %s3280_s15   ;;  %s3347_s17 = sadd.s32 1, %s3280_s15   ;;  %s3280_s15 = sphi %s3331_s15, %s4063_s15   ;;  %s3276_s14 = sphi %s3329_s14, %s4062_s14   ;;  %s3272_s13 = sphi %s3327_s13, %s4061_s13   ;;  %s3268_s12 = sphi %s3325_s12, %s4060_s12  }
   0x5   : > { %s42_s18 = ssub.s32 %s3280_s15, %s3347_s17  ;;  %s45_s19 = sadd.s32 1, %s3276_s14 }
   0x6   : > { %p43_p0 = scmp.eq.s32.totalorder %s42_s18, 0  ;;  %p52_p1 = scmp.ne.s32.totalorder %s3276_s14, %s3272_s13 }
   0x7   : > { %p53_p2 = scmp.eq.s32.totalorder %s3280_s15, 0  ;;  %p58_p3 = scmp.ne.s32.totalorder %s3272_s13, %s3268_s12 }
   0x8   : > { %s3357_s20 = scalar_select %p43_p0, %s3276_s14, %s45_s19  }
   0x9   : > { %p54_p4 = por %p53_p2, %p52_p1  ;;  %p4045_p5 = scmp.eq.s32.totalorder %s3344_s16, 0 }
   0xa   : > { %p2471_p6 = scmp.ge.s32.totalorder %s3280_s15, 1  ;;  %p116_p7 = scmp.lt.s32.totalorder %s3280_s15, 3 }
   0xb   : > { %p3364_p8 = por %p4045_p5, %p58_p3  ;;  %s3282_s23 = smov [#allocation6]  }
   0xc   : > { %p3368_p9 = pnand %p2471_p6, %p116_p7  ;;  %s139_s24 = sshll.u32 %s3282_s23, 4  ;;  %s140_s24 = int_to_ptr.vmem [resolvable:$true] %s139_s24 }
   0xd   : > { %s4049_s21 = scalar_select %p3364_p8, 1, 0 }
   0xe   : > { %s4050_s22 = scalar_select %p3368_p9, 1, 0 }
   0xf   : > { %p2941_p10 = pneg %p3368_p9  ;;  %p2954_p12 = scmp.lt.s32.totalorder %s3280_s15, 2 }
  0x10   : > { %s3152_s29 = scalar_lea.hbm %s4043_s2, 512 }
  0x11   : > { %p3376_p11 = pnand %p2941_p10, %p4045_p5  ;;  %p3381_p13 = pnand %p2954_p12, %p54_p4 }
  0x12   : > { %p3153_p0 = scmp.ne.s32.totalorder %s4043_s2, %s3152_s29  ;;  %p3159_p4 = scmp.lt.u32.totalorder %s3152_s29, %s4043_s2 }
  0x13   : > { %s4052_s26 = scalar_select %p3381_p13, 1, 0 }
  0x14   : > { %p3154_p1 = pneg %p3376_p11 }
  0x16   : > { %p3155_p2 = pnand %p3154_p1, %p3153_p0 }
  0x18   : > { %p3156_p3 = pneg %p3155_p2 }
  0x1a   : > { %p3161_p6 = pnand %p3159_p4, %p3156_p3 }
  0x1c   : > { %3164 = shalt.err (!%p3161_p6)
}
  0x1d   : > { %s3165_s7 = scalar_lea.vmem %s140_s24, 512  ;;  %p3173_p5 = scmp.lt.s32.totalorder %s140_s24, %s140_s24 }
  0x1e   : > { %p3166_p7 = scmp.ne.s32.totalorder %s140_s24, %s3165_s7  ;;  %p3174_p8 = scmp.lt.s32.totalorder %s3165_s7, %s3165_s7 }
  0x20   : > { %p3168_p10 = pnand %p3166_p7, %p3154_p1  ;;  %p3175_p9 = por %p3174_p8, %p3173_p5 }
  0x22   : > { %p3169_p12 = pneg %p3168_p10 }
  0x24   : > { %p3176_p13 = pnand %p3175_p9, %p3169_p12 }
  0x26   : > { %3179 = shalt.err (!%p3176_p13)
}
  0x27   : > { %s3283_s8 = smov 128   ;;  %s3284_s9 = smov 8  }
  0x28   : > { %2947 = dma.hbm_to_vmem [thread:$0]  (!%p3376_p11), %s4043_s2, 512, %s140_s24, [#allocation5], %s3283_s8, %s3283_s8, %s3284_s9  }
  0x29   : > { %s3285_s12 = smov [#allocation2]   ;;  %s153_s19 = sand.u32 1, %s3280_s15  }
  0x2a   : > { %s129_s18 = sshll.u32 %s3285_s12, 4  ;;  %s3180_s28 = scalar_lea.hbm %s4041_s0, 16  ;;  %s130_s18 = int_to_ptr.vmem [resolvable:$true] %s129_s18 }
  0x2b   : > { %p3181_p5 = scmp.ne.s32.totalorder %s4041_s0, %s3180_s28  ;;  %p3187_p13 = scmp.lt.u32.totalorder %s3180_s28, %s4041_s0 }
  0x2d   : > { %p3183_p8 = pnand %p3181_p5, %p3154_p1 }
  0x2f   : > { %p3184_p9 = pneg %p3183_p8 }
  0x31   : > { %p3189_p0 = pnand %p3187_p13, %p3184_p9 }
  0x33   : > { %3192 = shalt.err (!%p3189_p0)
}
  0x34   : > { %s3193_s24 = scalar_lea.vmem %s130_s18, 16  ;;  %s3200_s6 = scalar_lea.vmem %s130_s18, 32 }
  0x35   : > { %p3194_p2 = scmp.ne.s32.totalorder %s130_s18, %s3193_s24  ;;  %p3201_p6 = scmp.lt.s32.totalorder %s130_s18, %s130_s18 }
  0x36   : > { %p3202_p7 = scmp.lt.s32.totalorder %s3200_s6, %s3193_s24 }
  0x37   : > { %p3196_p3 = pnand %p3194_p2, %p3154_p1 }
  0x38   : > { %p3203_p10 = por %p3202_p7, %p3201_p6 }
  0x39   : > { %p3197_p4 = pneg %p3196_p3 }
  0x3b   : > { %p3204_p12 = pnand %p3203_p10, %p3197_p4 }
  0x3d   : > { %3207 = shalt.err (!%p3204_p12)
}
  0x3e   : > { %2944 = dma.hbm_to_vmem [thread:$0]  (!%p3376_p11), %s4041_s0, 16, %s130_s18, [#allocation3]  }
  0x3f   : > { %s155_s11 = sand.u32 1, %s3276_s14   ;;  %s2559_s12 = sshll.u32 %s3280_s15, 10 }
  0x40   : > { %s2475_s23 = sshll.u32 %s155_s11, 6  ;;  %s3436_s29 = scalar_lea.hbm %s4042_s1, %s2559_s12 }
  0x41   : > { %s157_s25 = scalar_lea.vmem [#allocation4], %s2475_s23  ;;  %s3440_s4 = scalar_lea.sflag [#allocation5], %s153_s19 }
  0x42   : > { %s164_s30 = sshll.u32 %s157_s25, 4  ;;  %s3208_s5 = scalar_lea.hbm %s3436_s29, 1024  ;;  %s3438_s30 = int_to_ptr.vmem [resolvable:$true] %s164_s30 }
  0x43   : > { %p3209_p11 = scmp.ne.s32.totalorder %s3436_s29, %s3208_s5  ;;  %p4053_p1 = scmp.ne.s32.totalorder %s4052_s26, 0 }
  0x44   : > { %s3213_s24 = scalar_lea.hbm %s4042_s1, 2048  ;;  %p3214_p13 = scmp.lt.u32.totalorder %s3436_s29, %s4042_s1 }
  0x45   : > { %p3210_p5 = pneg %p4053_p1  ;;  %p3215_p0 = scmp.lt.u32.totalorder %s3213_s24, %s3208_s5 }
  0x46   : > { %p3217_p3 = scmp.lt.u32.totalorder %s3208_s5, %s3436_s29 }
  0x47   : > { %p3211_p8 = pnand %p3210_p5, %p3209_p11  ;;  %p3216_p2 = por %p3215_p0, %p3214_p13 }
  0x49   : > { %p3212_p9 = pneg %p3211_p8  ;;  %p3218_p4 = por %p3217_p3, %p3216_p2 }
  0x4b   : > { %p3219_p6 = pnand %p3218_p4, %p3212_p9 }
  0x4d   : > { %3222 = shalt.err (!%p3219_p6)
}
  0x4e   : > { %s3223_s19 = scalar_lea.vmem %s3438_s30, 1024  ;;  %s3286_s10 = smov [#allocation4]  }
  0x4f   : > { %p3224_p7 = scmp.ne.s32.totalorder %s3438_s30, %s3223_s19  ;;  %s3228_s11 = sshll.u32 %s3286_s10, 4  ;;  %s3229_s11 = int_to_ptr.vmem [resolvable:$false] %s3228_s11 }
  0x50   : > { %s3230_s12 = scalar_lea.vmem %s3229_s11, 2048  ;;  %p3231_p11 = scmp.lt.s32.totalorder %s3438_s30, %s3229_s11 }
  0x51   : > { %p3226_p10 = pnand %p3224_p7, %p3210_p5  ;;  %p3232_p8 = scmp.lt.s32.totalorder %s3230_s12, %s3223_s19 }
  0x53   : > { %p3227_p12 = pneg %p3226_p10  ;;  %p3233_p13 = por %p3232_p8, %p3231_p11 }
  0x55   : > { %p3234_p0 = pnand %p3233_p13, %p3227_p12 }
  0x57   : > { %3237 = shalt.err (!%p3234_p0)
}
  0x58   : > { %2951 = dma.hbm_to_vmem [thread:$0]  (!%p4053_p1), %s3436_s29, 1024, %s3438_s30, %s3440_s4, %s3283_s8, %s3283_s8, %s3284_s9  }
  0x59   : > { %p4054_p5 = scmp.ne.s32.totalorder %s4050_s22, 0 }
  0x5a   : > { %p4055_p9 = scmp.eq.s32.totalorder (!%p4054_p5), %s3344_s16, 0 }
  0x5b   : > { %176 = sbr.rel (%p4054_p5) target bundleno = 2953 (0xb89), region = 32 }
  0x62   : > { %3255 = dma.done.wait (%p4055_p9), [#allocation3], 16   ;;  %p4056_p2 = pmov %p4055_p9 }
  0x63   : > { %s182_s26 = sand.u32 1, %s3344_s16   ;;  %s184_s23 = sand.u32 1, %s3272_s13  }
  0x64   : > { %3257 = vsyncadd (%p4056_p2), [#allocation3], 4294967280  ;;  %s2480_s27 = sshll.u32 %s184_s23, 6  ;;  %s183_s28 = scalar_lea.sflag [#allocation5], %s182_s26 }
  0x65   : > { %s3479_s25 = scalar_lea.vmem [#allocation4], %s2480_s27  ;;  %p4057_p3 = scmp.ne.s32.totalorder %s4049_s21, 0 }
  0x67   : > { %3259 = dma.done.wait (%p4057_p3), %s183_s28, 1024  }
  0x68   : > { %3261 = vsyncadd (%p4057_p3), %s183_s28, 4294966272  ;;  %p4058_p1 = pmov %p4056_p2 }
  0x6a   : > { %3263 = dma.done.wait (%p4058_p1), [#allocation5], 512   ;;  %p4059_p4 = pmov %p4058_p1 }
  0x6b   : > { %v3490_v0 = vld [vmem:[%s3479_s25] sm:$0xff]  ;;  %v3493_v1 = vld [vmem:[%s3479_s25 + $0x8] sm:$0xff]  ;;  %v3496_v2 = vld [vmem:[%s3479_s25 + $0x10] sm:$0xff]  ;;  %vm275_vm0 = vcmask 326912   ;;  %vm623_vm1 = vcmask 130112   ;;  %vm663_vm2 = vcmask 392512  }
  0x6c   : > { %3265 = vsyncadd (%p4059_p4), [#allocation5], 4294966784  ;;  %v3499_v3 = vld [vmem:[%s3479_s25 + $0x18] sm:$0xff]  ;;  %v3503_v4 = vmul.f32 %v3490_v0, %v3490_v0  ;;  %v3507_v5 = vmul.f32 %v3493_v1, %v3493_v1  ;;  %v3511_v6 = vmul.f32 %v3496_v2, %v3496_v2  ;;  %v3514_v7 = vld [vmem:[%s3479_s25 + $0x20] sm:$0xff]  ;;  %vm1287_vm3 = vcmask 195712   ;;  %s3288_s21 = smov 96  }
  0x6d   : > { %v3518_v8 = vmul.f32 %v3499_v3, %v3499_v3  ;;  %v3521_v9 = vld [vmem:[%s3479_s25 + $0x28] sm:$0xff]  ;;  %v3524_v10 = vld [vmem:[%s3479_s25 + $0x30] sm:$0xff]  ;;  %v3529_v12 = vld [vmem:[%s3479_s25 + $0x38] sm:$0xff]  ;;  %v3533_v13 = vmul.f32 %v3514_v7, %v3514_v7  ;;  %vm1327_vm4 = vcmask 458112   ;;  %vm1830_vm5 = vcmask 261312   ;;  %s3292_s22 = smov 120  }
  0x6e   : > { %v276_v11 = vsel %vm275_vm0, %v3503_v4, 0.0  ;;  %v277_v14 = vsel %vm275_vm0, %v3507_v5, 0.0  ;;  %v279_v15 = vsel %vm275_vm0, %v3511_v6, 0.0  ;;  %v3541_v17 = vmul.f32 %v3521_v9, %v3521_v9  ;;  %s3293_s8 = smov 64   ;;  %s3294_s9 = smov 88  }
  0x6f   : > { %v278_v16 = vadd.f32 %v277_v14, %v276_v11  ;;  %v3545_v18 = vmul.f32 %v3524_v10, %v3524_v10  ;;  %v281_v19 = vsel %vm275_vm0, %v3518_v8, 0.0  ;;  %v3551_v20 = vmul.f32 %v3529_v12, %v3529_v12  ;;  %s3296_s29 = smov 112   ;;  %s3297_s30 = smov 56  }
  0x70   : > { %v283_v22 = vsel %vm275_vm0, %v3533_v13, 0.0  ;;  %v624_v23 = vsel %vm623_vm1, %v3503_v4, 0.0  ;;  %v625_v24 = vsel %vm623_vm1, %v3507_v5, 0.0  ;;  %v664_v26 = vsel %vm663_vm2, %v3503_v4, 0.0  ;;  %s3298_s4 = smov 80   ;;  %s3300_s5 = smov 104  }
  0x71   : > { %v280_v21 = vadd.f32 %v279_v15, %v278_v16  ;;  %v665_v27 = vsel %vm663_vm2, %v3507_v5, 0.0  ;;  %v285_v28 = vsel %vm275_vm0, %v3541_v17, 0.0  ;;  %v287_v29 = vsel %vm275_vm0, %v3545_v18, 0.0  ;;  %s3301_s15 = smov 48   ;;  %s3302_s18 = smov 72  }
  0x72   : > { %v666_v30 = vadd.f32 %v665_v27, %v664_v26  ;;  %v667_v31 = vsel %vm663_vm2, %v3511_v6, 0.0  ;;  %v289_v33 = vsel %vm275_vm0, %v3551_v20, 0.0  ;;  %v626_v34 = vadd.f32 %v625_v24, %v624_v23  ;;  %s3304_s24 = smov 40   ;;  %p213_p6 = scmp.lt.s32.totalorder %s3344_s16, 1 }
  0x73   : > { %v282_v25 = vadd.f32 %v281_v19, %v280_v21  ;;  %v669_v35 = vsel %vm663_vm2, %v3518_v8, 0.0  ;;  %v627_v36 = vsel %vm623_vm1, %v3511_v6, 0.0  ;;  %v1288_v38 = vsel %vm1287_vm3, %v3503_v4, 0.0 }
  0x74   : > { %v668_v37 = vadd.f32 %v667_v31, %v666_v30  ;;  %v1289_v39 = vsel %vm1287_vm3, %v3507_v5, 0.0  ;;  %v671_v41 = vsel %vm663_vm2, %v3533_v13, 0.0  ;;  %v1291_v43 = vsel %vm1287_vm3, %v3511_v6, 0.0  ;;  %s4065_s16 = smov (!%p213_p6, %s3344_s16), 1 }
  0x75   : > { %v284_v32 = vadd.f32 %v283_v22, %v282_v25  ;;  %v1290_v42 = vadd.f32 %v1289_v39, %v1288_v38  ;;  %v629_v44 = vsel %vm623_vm1, %v3518_v8, 0.0  ;;  %v631_v45 = vsel %vm623_vm1, %v3533_v13, 0.0  ;;  %s2560_s6 = sshll.u32 %s4065_s16, 6 }
  0x76   : > { %v670_v46 = vadd.f32 %v669_v35, %v668_v37  ;;  %v1293_v47 = vsel %vm1287_vm3, %v3518_v8, 0.0  ;;  %v628_v49 = vadd.f32 %v627_v36, %v626_v34  ;;  %v673_v50 = vsel %vm663_vm2, %v3541_v17, 0.0  ;;  %s217_s10 = scalar_lea.vmem %s4044_s3, %s2560_s6 }
  0x77   : > { %v286_v40 = vadd.f32 %v285_v28, %v284_v32  ;;  %v1292_v51 = vadd.f32 %v1291_v43, %v1290_v42  ;;  %v1295_v53 = vsel %vm1287_vm3, %v3533_v13, 0.0  ;;  %v1328_v54 = vsel %vm1327_vm4, %v3503_v4, 0.0 }
  0x78   : > { %v672_v52 = vadd.f32 %v671_v41, %v670_v46  ;;  %v1329_v55 = vsel %vm1327_vm4, %v3507_v5, 0.0  ;;  %v675_v57 = vsel %vm663_vm2, %v3545_v18, 0.0  ;;  %v1297_v61 = vsel %vm1287_vm3, %v3541_v17, 0.0 }
  0x79   : > { %v288_v48 = vadd.f32 %v287_v29, %v286_v40  ;;  %v1294_v58 = vadd.f32 %v1293_v47, %v1292_v51  ;;  %v1330_v59 = vadd.f32 %v1329_v55, %v1328_v54  ;;  %v1331_v62 = vsel %vm1327_vm4, %v3511_v6, 0.0 }
  0x7a   : > { %v674_v60 = vadd.f32 %v673_v50, %v672_v52  ;;  %v1333_v63 = vsel %vm1327_vm4, %v3518_v8, 0.0  ;;  %v677_v14 = vsel %vm663_vm2, %v3551_v20, 0.0  ;;  %v630_v19 = vadd.f32 %v629_v44, %v628_v49 }
  0x7b   : > { %v290_v56 = vadd.f32 %v289_v33, %v288_v48  ;;  %v1296_v15 = vadd.f32 %v1295_v53, %v1294_v58  ;;  %v1332_v16 = vadd.f32 %v1331_v62, %v1330_v59  ;;  %v1299_v22 = vsel %vm1287_vm3, %v3545_v18, 0.0 }
  0x7c   : > { %v676_v21 = vadd.f32 %v675_v57, %v674_v60  ;;  %v1335_v23 = vsel %vm1327_vm4, %v3533_v13, 0.0  ;;  %v1301_v26 = vsel %vm1287_vm3, %v3551_v20, 0.0  ;;  %v1337_v29 = vsel %vm1327_vm4, %v3541_v17, 0.0 }
  0x7d   : > { %v291_v11 = vrot.slane %v290_v56, 4  ;;  %v1298_v25 = vadd.f32 %v1297_v61, %v1296_v15  ;;  %v1334_v27 = vadd.f32 %v1333_v63, %v1332_v16  ;;  %v1831_v30 = vsel %vm1830_vm5, %v3503_v4, 0.0 }
  0x7e   : > { %v3613_v28 = vadd.f32 %v677_v14, %v676_v21  ;;  %v1832_v31 = vsel %vm1830_vm5, %v3507_v5, 0.0  ;;  %v1834_v35 = vsel %vm1830_vm5, %v3511_v6, 0.0  ;;  %v632_v36 = vadd.f32 %v631_v45, %v630_v19 }
  0x7f   : > { %v292_v24 = vadd.f32 %v291_v11, %v290_v56  ;;  %v1300_v33 = vadd.f32 %v1299_v22, %v1298_v25  ;;  %v1336_v34 = vadd.f32 %v1335_v23, %v1334_v27  ;;  %v633_v37 = vsel %vm623_vm1, %v3541_v17, 0.0 }
  0x80   : > { %v1339_v38 = vsel %vm1327_vm4, %v3545_v18, 0.0  ;;  %v1833_v39 = vadd.f32 %v1832_v31, %v1831_v30  ;;  %v1836_v43 = vsel %vm1830_vm5, %v3518_v8, 0.0  ;;  %v1341_v44 = vsel %vm1327_vm4, %v3551_v20, 0.0 }
  0x81   : > { %v293_v32 = vrot.slane %v292_v24, 2  ;;  %v3627_v41 = vadd.f32 %v1301_v26, %v1300_v33  ;;  %v1338_v42 = vadd.f32 %v1337_v29, %v1336_v34  ;;  %v1838_v48 = vsel %vm1830_vm5, %v3533_v13, 0.0 }
  0x82   : > { %v1835_v46 = vadd.f32 %v1834_v35, %v1833_v39  ;;  %vm1870_vm6 = vcmask 523712   ;;  %v634_v49 = vadd.f32 %v633_v37, %v632_v36  ;;  %v635_v52 = vsel %vm623_vm1, %v3545_v18, 0.0 }
  0x83   : > { %v294_v40 = vadd.f32 %v293_v32, %v292_v24  ;;  %v1340_v45 = vadd.f32 %v1339_v38, %v1338_v42  ;;  %v1840_v55 = vsel %vm1830_vm5, %v3541_v17, 0.0  ;;  %v1871_v56 = vsel %vm1870_vm6, %v3503_v4, 0.0 }
  0x84   : > { %v1837_v50 = vadd.f32 %v1836_v43, %v1835_v46  ;;  %v1872_v57 = vsel %vm1870_vm6, %v3507_v5, 0.0  ;;  %v636_v58 = vadd.f32 %v635_v52, %v634_v49  ;;  %v1842_v59 = vsel %vm1830_vm5, %v3545_v18, 0.0 }
  0x85   : > { %v295_v47 = vrot.slane %v294_v40, 1  ;;  %v3637_v53 = vadd.f32 %v1341_v44, %v1340_v45  ;;  %v637_v60 = vsel %vm623_vm1, %v3551_v20, 0.0  ;;  %v1873_v62 = vadd.f32 %v1872_v57, %v1871_v56 }
  0x86   : > { %v1839_v54 = vadd.f32 %v1838_v48, %v1837_v50  ;;  %v1874_v63 = vsel %vm1870_vm6, %v3511_v6, 0.0  ;;  %vm235_vm7 = vcmask 64512   ;;  %v1844_v14 = vsel %vm1830_vm5, %v3551_v20, 0.0 }
  0x87   : > { %v296_v51 = vadd.f32 %v295_v47, %v294_v40  ;;  %v1876_v15 = vsel %vm1870_vm6, %v3518_v8, 0.0  ;;  %v638_v16 = vadd.f32 %v637_v60, %v636_v58  ;;  %v1875_v19 = vadd.f32 %v1874_v63, %v1873_v62 }
  0x88   : > { %v1841_v61 = vadd.f32 %v1840_v55, %v1839_v54  ;;  %v1878_v21 = vsel %vm1870_vm6, %v3533_v13, 0.0  ;;  %v237_v22 = vsel %vm235_vm7, %v3507_v5, 0.0  ;;  %v236_v25 = vsel %vm235_vm7, %v3503_v4, 0.0 }
  0x89   : > { %3096 = vrsqrt.f32 %v296_v51  ;;  %v1877_v24 = vadd.f32 %v1876_v15, %v1875_v19  ;;  %v639_v26 = vrot.slane %v638_v16, 4  ;;  %v1880_v29 = vsel %vm1870_vm6, %v3541_v17, 0.0 }
  0x8a   : > { %v1843_v11 = vadd.f32 %v1842_v59, %v1841_v61  ;;  %v239_v31 = vsel %vm235_vm7, %v3511_v6, 0.0  ;;  %vm299_vm8 = vcmp.eq.f32.partialorder %v296_v51, inf  ;;  %v302_v32 = vand.u32 2147483648, %v296_v51 }
  0x8b   : > { %v1879_v27 = vadd.f32 %v1878_v21, %v1877_v24  ;;  %v238_v33 = vadd.f32 %v237_v22, %v236_v25  ;;  %vm301_vm9 = vcmp.eq.f32.partialorder %v296_v51, 0.0  ;;  %v241_v5 = vsel %vm235_vm7, %v3518_v8, 0.0 }
  0x8c   : > { %v3659_v23 = vadd.f32 %v1844_v14, %v1843_v11  ;;  %v1882_v4 = vsel %vm1870_vm6, %v3545_v18, 0.0  ;;  %v640_v37 = vadd.f32 %v639_v26, %v638_v16  ;;  %v243_v39 = vsel %vm235_vm7, %v3533_v13, 0.0 }
  0x8d   : > { %v1881_v35 = vadd.f32 %v1880_v29, %v1879_v27  ;;  %v240_v38 = vadd.f32 %v239_v31, %v238_v33  ;;  %v1884_v43 = vsel %vm1870_vm6, %v3551_v20, 0.0  ;;  %v245_v8 = vsel %vm235_vm7, %v3541_v17, 0.0 }
  0x8e   : > { %v641_v46 = vrot.slane %v640_v37, 2  ;;  %v247_v48 = vsel %vm235_vm7, %v3545_v18, 0.0  ;;  %v3287_v49 = vmov 0.0|0.0   ;;  %vm3289_vm10 = vmmov 0  }
  0x8f   : > { %v1883_v42 = vadd.f32 %v1882_v4, %v1881_v35  ;;  %v242_v44 = vadd.f32 %v241_v5, %v240_v38  ;;  %2857 = vmatprep.subr.bf16.mxu0 %v3287_v49  ;;  %v3290_v25 = vmov 0.0   ;;  %vm379_vm15 = vcmask 523264  }
  0x90   : > { %v642_v13 = vadd.f32 %v641_v46, %v640_v37  ;;  %2685 = vmatprep.mubr.msk.f32.mxu0 %vm3289_vm10, %v3290_v25 }
  0x91   : > { %v3677_v47 = vadd.f32 %v1884_v43, %v1883_v42  ;;  %v244_v45 = vadd.f32 %v243_v39, %v242_v44  ;;  %v3698_v42 = vld [vmem:[#allocation2] ss:$0 sm:$0xff]  ;;  %v3291_v43 = vmov 0  }
  0x92   : > { %v643_v54 = vrot.slane %v642_v13, 1  ;;  %3031 = vset.pattern.permute.xlu1 %v3291_v43 }
  0x93   : > { %v3097_v30 = vpop.eup %3096  ;;  %v246_v50 = vadd.f32 %v245_v8, %v244_v45 }
  0x94   : > { %v298_v34 = vmul.f32 %v3097_v30, %v296_v51  ;;  %v644_v18 = vadd.f32 %v643_v54, %v642_v13 }
  0x95   : > { %v248_v52 = vadd.f32 %v247_v48, %v246_v50 }
  0x96   : > { %v300_v36 = vsel %vm299_vm8, %v296_v51, %v298_v34  ;;  %v249_v51 = vsel %vm235_vm7, %v3551_v20, 0.0  ;;  %vm647_vm11 = vcmp.eq.f32.partialorder %v644_v18, inf  ;;  %v650_v30 = vand.u32 2147483648, %v644_v18 }
  0x97   : > { %v303_v40 = vsel %vm301_vm9, %v302_v32, %v300_v36  ;;  %v250_v55 = vadd.f32 %v249_v51, %v248_v52  ;;  %vm649_vm12 = vcmp.eq.f32.partialorder %v644_v18, 0.0 }
  0x98   : > { %v304_v6 = vmax.f32 %v303_v40, 1e-12 }
  0x99   : > { %v251_v57 = vrot.slane %v250_v55, 4 }
  0x9a   : > { %3098 = vrcp.f32 %v304_v6 }
  0x9b   : > { %v252_v60 = vadd.f32 %v251_v57, %v250_v55  ;;  %3100 = vrsqrt.f32 %v644_v18 }
  0x9d   : > { %v253_v11 = vrot.slane %v252_v60, 2 }
  0x9f   : > { %v254_v21 = vadd.f32 %v253_v11, %v252_v60 }
  0xa1   : > { %v255_v24 = vrot.slane %v254_v21, 1 }
  0xa3   : > { %v256_v26 = vadd.f32 %v255_v24, %v254_v21  ;;  %v679_v24 = vrot.slane %v3613_v28, 4 }
  0xa4   : > { %v3099_v56 = vpop.eup %3098 }
  0xa5   : > { %v307_v17 = vmul.f32 %v3099_v56, %v3490_v0  ;;  %v308_v58 = vmul.f32 %v3099_v56, %v3493_v1  ;;  %v309_v59 = vmul.f32 %v3099_v56, %v3496_v2  ;;  %v310_v61 = vmul.f32 %v3099_v56, %v3499_v3  ;;  %v3101_v27 = vpop.eup %3100 }
  0xa6   : > { %v311_v63 = vmul.f32 %v3099_v56, %v3514_v7  ;;  %v312_v20 = vmul.f32 %v3099_v56, %v3521_v9  ;;  %v313_v16 = vmul.f32 %v3099_v56, %v3524_v10  ;;  %v314_v19 = vmul.f32 %v3099_v56, %v3529_v12 }
  0xa7   : > { %v3011_v62 = vpack.i.bf16 %v308_v58, %v307_v17  ;;  %v3016_v14 = vpack.i.bf16 %v310_v61, %v309_v59  ;;  %3102 = vrsqrt.f32 %v256_v26  ;;  %v646_v29 = vmul.f32 %v3101_v27, %v644_v18 }
  0xa8   : > { %v3021_v15 = vpack.i.bf16 %v312_v20, %v311_v63  ;;  %v3026_v22 = vpack.i.bf16 %v314_v19, %v313_v16  ;;  %vm259_vm13 = vcmp.eq.f32.partialorder %v256_v26, inf  ;;  %v262_v33 = vand.u32 2147483648, %v256_v26 }
  0xa9   : > { %3012 = vrot.lane.b32.xlu0 %v3011_v62, %s3288_s21  ;;  %v648_v32 = vsel %vm647_vm11, %v644_v18, %v646_v29  ;;  %vm261_vm14 = vcmp.eq.f32.partialorder %v256_v26, 0.0 }
  0xaa   : > { %3022 = vrot.lane.b32.xlu1 %v3021_v15, %s3288_s21  ;;  %v651_v5 = vsel %vm649_vm12, %v650_v30, %v648_v32 }
  0xab   : > { %v652_v37 = vmax.f32 %v651_v5, 1e-12 }
  0xad   : > { %3017 = vrot.lane.b32.xlu0 %v3016_v14, %s3288_s21 }
  0xae   : > { %3027 = vrot.lane.b32.xlu1 %v3026_v22, %s3288_s21 }
  0xb1   : > { %v3103_v31 = vpop.eup %3102 }
  0xb2   : > { %v258_v34 = vmul.f32 %v3103_v31, %v256_v26  ;;  %459 = vperm.xlu1 %3031, %v3698_v42  }
  0xb4   : > { %v260_v35 = vsel %vm259_vm13, %v256_v26, %v258_v34  ;;  %v680_v26 = vadd.f32 %v679_v24, %v3613_v28 }
  0xb5   : > { %v263_v4 = vsel %vm261_vm14, %v262_v33, %v260_v35 }
  0xb6   : > { %v264_v36 = vmax.f32 %v263_v4, 1e-12  ;;  %v681_v27 = vrot.slane %v680_v26, 2 }
  0xb8   : > { %3104 = vrcp.f32 %v264_v36  ;;  %v682_v29 = vadd.f32 %v681_v27, %v680_v26 }
  0xb9   : > { %3106 = vrcp.f32 %v652_v37 }
  0xba   : > { %v683_v30 = vrot.slane %v682_v29, 1 }
  0xbc   : > { %v684_v31 = vadd.f32 %v683_v30, %v682_v29 }
  0xbe   : > { %3108 = vrsqrt.f32 %v684_v31  ;;  %vm687_vm0 = vcmp.eq.f32.partialorder %v684_v31, inf  ;;  %v690_v37 = vand.u32 2147483648, %v684_v31  ;;  %vm689_vm1 = vcmp.eq.f32.partialorder %v684_v31, 0.0 }
  0xc2   : > { %v3105_v38 = vpop.eup %3104 }
  0xc3   : > { %v267_v39 = vmul.f32 %v3105_v38, %v3490_v0  ;;  %v3695_v40 = vpop.eup %3106  ;;  %v268_v6 = vmul.f32 %v3105_v38, %v3493_v1  ;;  %v269_v46 = vmul.f32 %v3105_v38, %v3496_v2  ;;  %v270_v8 = vmul.f32 %v3105_v38, %v3499_v3 }
  0xc4   : > { %v655_v44 = vmul.f32 %v3695_v40, %v3490_v0  ;;  %v271_v45 = vmul.f32 %v3105_v38, %v3514_v7  ;;  %v272_v48 = vmul.f32 %v3105_v38, %v3521_v9  ;;  %v273_v13 = vmul.f32 %v3105_v38, %v3524_v10 }
  0xc5   : > { %v274_v50 = vmul.f32 %v3105_v38, %v3529_v12  ;;  %v656_v15 = vmul.f32 %v3695_v40, %v3493_v1  ;;  %v658_v16 = vmul.f32 %v3695_v40, %v3499_v3  ;;  %v659_v19 = vmul.f32 %v3695_v40, %v3514_v7 }
  0xc6   : > { %711 = vrot.lane.b32.xlu1 %v655_v44, %s3292_s22  ;;  %v660_v21 = vmul.f32 %v3695_v40, %v3521_v9  ;;  %v662_v22 = vmul.f32 %v3695_v40, %v3529_v12  ;;  %v661_v43 = vmul.f32 %v3695_v40, %v3524_v10 }
  0xc8   : > { %v3109_v33 = vpop.eup %3108 }
  0xc9   : > { %v686_v4 = vmul.f32 %v3109_v33, %v684_v31 }
  0xcb   : > { %315 = vxpose.xlu0.b32.start [1/8] (short) (narrow) %v267_v39, 8  ;;  %v688_v38 = vsel %vm687_vm0, %v684_v31, %v686_v4 }
  0xcc   : > { %v691_v39 = vsel %vm689_vm1, %v690_v37, %v688_v38 }
  0xcd   : > { %v692_v28 = vmax.f32 %v691_v39, 1e-12 }
  0xcf   : > { %316 = vxpose.xlu0.b32.cont [2/8] (short) (narrow) %v268_v6, 8  ;;  %3110 = vrcp.f32 %v692_v28  ;;  %v657_v6 = vmul.f32 %v3695_v40, %v3496_v2 }
  0xd3   : > { %317 = vxpose.xlu0.b32.cont [3/8] (short) (narrow) %v269_v46, 8 }
  0xd7   : > { %318 = vxpose.xlu0.b32.cont [4/8] (short) (narrow) %v270_v8, 8 }
  0xd9   : > { %v3111_v44 = vpop.eup %3110 }
  0xda   : > { %v697_v46 = vmul.f32 %v3111_v44, %v3496_v2  ;;  %v698_v8 = vmul.f32 %v3111_v44, %v3499_v3  ;;  %v701_v40 = vmul.f32 %v3111_v44, %v3524_v10 }
  0xdb   : > { %319 = vxpose.xlu0.b32.cont [5/8] (short) (narrow) %v271_v45, 8 }
  0xdc   : > { %v3037_v45 = vpack.i.bf16 %v698_v8, %v697_v46 }
  0xdf   : > { %320 = vxpose.xlu0.b32.cont [6/8] (short) (narrow) %v272_v48, 8  ;;  %v695_v48 = vmul.f32 %v3111_v44, %v3490_v0 }
  0xe3   : > { %321 = vxpose.xlu0.b32.cont [7/8] (short) (narrow) %v273_v13, 8  ;;  %v696_v13 = vmul.f32 %v3111_v44, %v3493_v1 }
  0xe7   : > { %322 = vxpose.xlu0.b32.end [8/8] (short) (narrow) %v274_v50, 8  ;;  %v3032_v50 = vpack.i.bf16 %v696_v13, %v695_v48 }
 0x110   : > { %713 = vrot.lane.b32.xlu0 %v656_v15, %s3292_s22 }
 0x114   : > { %717 = vrot.lane.b32.xlu0 %v658_v16, %s3292_s22 }
 0x118   : > { %719 = vrot.lane.b32.xlu0 %v659_v19, %s3292_s22 }
 0x11b   : > { %v3013_v51 = vpop.permute.xlu0 %3012 }
 0x11c   : > { %v3015_v52 = vunpack.i.h.bf16 %v3013_v51  ;;  %v3014_v54 = vunpack.i.l.bf16 %v3013_v51  ;;  %v3023_v55 = vpop.permute.xlu1 %3022  ;;  %721 = vrot.lane.b32.xlu0 %v660_v21, %s3292_s22  ;;  %v702_v51 = vmul.f32 %v3111_v44, %v3529_v12 }
 0x11d   : > { %v3025_v59 = vunpack.i.h.bf16 %v3023_v55  ;;  %v3024_v18 = vunpack.i.l.bf16 %v3023_v55 }
 0x11e   : > { %v2858_v56 = vpack.c.bf16 %v3015_v52, %v3014_v54  ;;  %v699_v52 = vmul.f32 %v3111_v44, %v3514_v7  ;;  %v700_v54 = vmul.f32 %v3111_v44, %v3521_v9  ;;  %v3047_v55 = vpack.i.bf16 %v702_v51, %v701_v40 }
 0x11f   : > { %v3018_v57 = vpop.permute.xlu0 %3017  ;;  %v2864_v62 = vpack.c.bf16 %v3025_v59, %v3024_v18 }
 0x120   : > { %v3020_v17 = vunpack.i.h.bf16 %v3018_v57  ;;  %v3019_v58 = vunpack.i.l.bf16 %v3018_v57  ;;  %2859 = vmatpush3.bf16.msra.mxu0 %v2858_v56  ;;  %v3028_v60 = vpop.permute.xlu1 %3027  ;;  %725 = vrot.lane.b32.xlu0 %v662_v22, %s3292_s22  ;;  %v3042_v56 = vpack.i.bf16 %v700_v54, %v699_v52 }
 0x121   : > { %2860 = vmatprep.subr.bf16.mxu0 %v3287_v49  ;;  %v3030_v63 = vunpack.i.h.bf16 %v3028_v60  ;;  %v3029_v20 = vunpack.i.l.bf16 %v3028_v60 }
 0x122   : > { %v2861_v61 = vpack.c.bf16 %v3020_v17, %v3019_v58 }
 0x123   : > { %v2867_v11 = vpack.c.bf16 %v3030_v63, %v3029_v20 }
 0x124   : > { %2862 = vmatpush3.bf16.msra.mxu0 %v2861_v61  ;;  %3033 = vrot.lane.b32.xlu0 %v3032_v50, %s3294_s9  ;;  %v1303_v50 = vrot.slane %v3627_v41, 4 }
 0x125   : > { %2863 = vmatprep.subr.bf16.mxu0 %v3287_v49 }
 0x126   : > { %v1304_v40 = vadd.f32 %v1303_v50, %v3627_v41 }
 0x128   : > { %2865 = vmatpush3.bf16.msra.mxu0 %v2864_v62  ;;  %486 = vrot.lane.b32.xlu0 %v3496_v2, %s3293_s8  ;;  %v1305_v51 = vrot.slane %v1304_v40, 2 }
 0x129   : > { %2866 = vmatprep.subr.bf16.mxu0 %v3287_v49 }
 0x12a   : > { %v1306_v52 = vadd.f32 %v1305_v51, %v1304_v40 }
 0x12c   : > { %2868 = vmatpush3.bf16.msra.mxu0 %v2867_v11  ;;  %488 = vrot.lane.b32.xlu0 %v3499_v3, %s3293_s8  ;;  %v3295_v11 = vmov 1   ;;  %v1307_v54 = vrot.slane %v1306_v52, 1 }
 0x12d   : > { %3052 = vset.pattern.permute.xlu0 %v3295_v11  ;;  %v1343_v11 = vrot.slane %v3637_v53, 4 }
 0x130   : > { %3043 = vrot.lane.b32.xlu0 %v3042_v56, %s3294_s9 }
 0x131   : > { %v460_v32 = vpop.permute.xlu1 %459 }
 0x134   : > { %494 = vrot.lane.b32.xlu0 %v3524_v10, %s3293_s8 }
 0x138   : > { %496 = vrot.lane.b32.xlu0 %v3529_v12, %s3293_s8  ;;  %v712_v57 = vpop.permute.xlu1 %711 }
 0x13c   : > { %873 = vperm.xlu0 %3052, %v3698_v42  }
 0x14b   : > { %v331_v14 = vpop.trf.xlu0 }
 0x14c   : > { %2686 = vmatmul.mubr.msk.f32.vlgmr.msra.gmra.mrb[0].mxu0 %vm379_vm15, %v331_v14 }
 0x182   : > { %v714_v20 = vpop.permute.xlu0 %713 }
 0x186   : > { %v718_v14 = vpop.permute.xlu0 %717 }
 0x18a   : > { %v720_v15 = vpop.permute.xlu0 %719 }
 0x18e   : > { %v722_v16 = vpop.permute.xlu0 %721 }
 0x192   : > { %v726_v19 = vpop.permute.xlu0 %725 }
 0x196   : > { %v3034_v29 = vpop.permute.xlu0 %3033 }
 0x19a   : > { %v487_v31 = vpop.permute.xlu0 %486 }
 0x21f   : > { %v449_v34 = vpop.f32.mrb[0].mxu0 }
 0x220   : > { %v462_v5 = vmul.f32 %v460_v32, %v449_v34  ;;  %v2687_v35 = vpop.f32.mrb[1].mxu0  ;;  %v489_v32 = vpop.permute.xlu0 %488  ;;  %v3036_v34 = vunpack.i.h.bf16 %v3034_v29 }
 0x222   : > { %v463_v36 = vsel %vm235_vm7, %v462_v5, -inf }
 0x223   : > { %464 = vmax.xlane.f32.xlu1 %v463_v36 }
 0x224   : > { %v3044_v36 = vpop.permute.xlu0 %3043 }
 0x225   : > { %v3046_v39 = vunpack.i.h.bf16 %v3044_v36  ;;  %v3045_v28 = vunpack.i.l.bf16 %v3044_v36 }
 0x227   : > { %v2876_v44 = vpack.c.bf16 %v3046_v39, %v3045_v28 }
 0x234   : > { %715 = vrot.lane.b32.xlu1 %v657_v6, %s3292_s22 }
 0x238   : > { %723 = vrot.lane.b32.xlu1 %v661_v43, %s3292_s22  ;;  %v495_v43 = vpop.permute.xlu0 %494 }
 0x23c   : > { %482 = vrot.lane.b32.xlu1 %v3490_v0, %s3293_s8 }
 0x240   : > { %484 = vrot.lane.b32.xlu1 %v3493_v1, %s3293_s8 }
 0x244   : > { %3038 = vrot.lane.b32.xlu1 %v3037_v45, %s3294_s9  ;;  %v497_v45 = vpop.permute.xlu0 %496 }
 0x248   : > { %490 = vrot.lane.b32.xlu1 %v3514_v7, %s3293_s8 }
 0x24c   : > { %492 = vrot.lane.b32.xlu1 %v3521_v9, %s3293_s8 }
 0x250   : > { %3048 = vrot.lane.b32.xlu1 %v3047_v55, %s3294_s9  ;;  %v1308_v55 = vadd.f32 %v1307_v54, %v1306_v52 }
 0x252   : > { %vm1311_vm2 = vcmp.eq.f32.partialorder %v1308_v55, inf  ;;  %vm1313_vm3 = vcmp.eq.f32.partialorder %v1308_v55, 0.0 }
 0x2b0   : > { %v465_v17 = vpop.xlane.xlu1 %464 }
 0x2b1   : > { %v466_v58 = vsub.f32 %v462_v5, %v465_v17  ;;  %v3035_v5 = vunpack.i.l.bf16 %v3034_v29  ;;  %v1314_v17 = vand.u32 2147483648, %v1308_v55 }
 0x2b3   : > { %v467_v59 = vmul.f32 1.442695, %v466_v58  ;;  %v2870_v4 = vpack.c.bf16 %v3036_v34, %v3035_v5  ;;  %v874_v34 = vpop.permute.xlu0 %873 }
 0x2b4   : > { %v716_v18 = vpop.permute.xlu1 %715 }
 0x2b5   : > { %3112 = vpow2.f32 %v467_v59 }
 0x2b8   : > { %v724_v60 = vpop.permute.xlu1 %723 }
 0x2bc   : > { %v483_v61 = vpop.permute.xlu1 %482 }
 0x2bd   : > { %2690 = vmatprep.mubr.msk.f32.mxu1 %vm235_vm7, %v483_v61 }
 0x2bf   : > { %v3113_v62 = vpop.eup %3112 }
 0x2c0   : > { %v469_v63 = vsel %vm235_vm7, %v3113_v62, 0.0  ;;  %v485_v21 = vpop.permute.xlu1 %484 }
 0x2c1   : > { %470 = vadd.xlane.f32.xlu1 %v469_v63 }
 0x2c4   : > { %v3039_v22 = vpop.permute.xlu1 %3038 }
 0x2c5   : > { %v3041_v37 = vunpack.i.h.bf16 %v3039_v22  ;;  %v3040_v38 = vunpack.i.l.bf16 %v3039_v22 }
 0x2c7   : > { %v2873_v6 = vpack.c.bf16 %v3041_v37, %v3040_v38 }
 0x2c8   : > { %v491_v24 = vpop.permute.xlu1 %490 }
 0x2cc   : > { %v493_v26 = vpop.permute.xlu1 %492 }
 0x2d0   : > { %v3049_v27 = vpop.permute.xlu1 %3048 }
 0x2d1   : > { %v3051_v46 = vunpack.i.h.bf16 %v3049_v27  ;;  %v3050_v8 = vunpack.i.l.bf16 %v3049_v27 }
 0x2d3   : > { %v2879_v48 = vpack.c.bf16 %v3051_v46, %v3050_v8 }
 0x2f4   : > { %735 = vxpose.xlu1.b32.start [1/8] (short) (narrow) %v712_v57, 8 }
 0x2f8   : > { %736 = vxpose.xlu1.b32.cont [2/8] (short) (narrow) %v714_v20, 8 }
 0x2fc   : > { %737 = vxpose.xlu1.b32.cont [3/8] (short) (narrow) %v716_v18, 8 }
 0x300   : > { %738 = vxpose.xlu1.b32.cont [4/8] (short) (narrow) %v718_v14, 8  ;;  %v1344_v14 = vadd.f32 %v1343_v11, %v3637_v53 }
 0x304   : > { %739 = vxpose.xlu1.b32.cont [5/8] (short) (narrow) %v720_v15, 8  ;;  %v1345_v15 = vrot.slane %v1344_v14, 2 }
 0x308   : > { %740 = vxpose.xlu1.b32.cont [6/8] (short) (narrow) %v722_v16, 8  ;;  %v1346_v16 = vadd.f32 %v1345_v15, %v1344_v14  ;;  %v3299_v14 = vmov 2  }
 0x309   : > { %3073 = vset.pattern.permute.xlu0 %v3299_v14 }
 0x30c   : > { %741 = vxpose.xlu1.b32.cont [7/8] (short) (narrow) %v724_v60, 8 }
 0x310   : > { %742 = vxpose.xlu1.b32.end [8/8] (short) (narrow) %v726_v19, 8  ;;  %v1347_v19 = vrot.slane %v1346_v16, 1 }
 0x312   : > { %v1348_v22 = vadd.f32 %v1347_v19, %v1346_v16 }
 0x314   : > { %vm1351_vm4 = vcmp.eq.f32.partialorder %v1348_v22, inf  ;;  %v1354_v5 = vand.u32 2147483648, %v1348_v22  ;;  %vm1353_vm5 = vcmp.eq.f32.partialorder %v1348_v22, 0.0 }
 0x34e   : > { %v471_v30 = vpop.xlane.xlu1 %470 }
 0x34f   : > { %3114 = vrcp.f32 %v471_v30 }
 0x350   : > { %3116 = vrsqrt.f32 %v1308_v55 }
 0x359   : > { %v3115_v33 = vpop.eup %3114 }
 0x35a   : > { %v473_v35 = vmul.f32 %v3115_v33, %v3113_v62  ;;  %v3117_v56 = vpop.eup %3116 }
 0x35b   : > { %v1310_v57 = vmul.f32 %v3117_v56, %v1308_v55 }
 0x35c   : > { %2688 = vmatprep.subr.msk.mxu1 %vm235_vm7, %v473_v35 }
 0x35d   : > { %2689 = vmatpush3.xpose.msk.msra.mxu1 %vm235_vm7, %v473_v35  ;;  %v1312_v58 = vsel %vm1311_vm2, %v1308_v55, %v1310_v57 }
 0x35e   : > { %2869 = vmatprep.subr.bf16.mxu1 %v3287_v49  ;;  %v1315_v59 = vsel %vm1313_vm3, %v1314_v17, %v1312_v58 }
 0x35f   : > { %v1316_v18 = vmax.f32 %v1315_v59, 1e-12 }
 0x360   : > { %2691 = vmatmul.mubr.msk.f32.vlgmr.msra.gmra.mrb[0].mxu1 %vm235_vm7, %v485_v21 }
 0x361   : > { %2693 = vmatprep.mubr.msk.f32.mxu1 %vm235_vm7, %v487_v31  ;;  %2871 = vmatpush3.bf16.msra.mxu1 %v2870_v4  ;;  %3118 = vrcp.f32 %v1316_v18 }
 0x362   : > { %2872 = vmatprep.subr.bf16.mxu1 %v3287_v49  ;;  %3120 = vrsqrt.f32 %v1348_v22 }
 0x364   : > { %2694 = vmatmul.mubr.msk.f32.gmra.mrb[2].mxu1 %vm235_vm7, %v489_v32 }
 0x365   : > { %2696 = vmatprep.mubr.msk.f32.mxu1 %vm235_vm7, %v491_v24  ;;  %2874 = vmatpush3.bf16.msra.mxu1 %v2873_v6 }
 0x366   : > { %2875 = vmatprep.subr.bf16.mxu1 %v3287_v49 }
 0x368   : > { %2697 = vmatmul.mubr.msk.f32.gmra.mrb[4].mxu1 %vm235_vm7, %v493_v26 }
 0x369   : > { %2877 = vmatpush3.bf16.msra.mxu1 %v2876_v44  ;;  %2699 = vmatprep.mubr.msk.f32.mxu1 %vm235_vm7, %v495_v43 }
 0x36a   : > { %2878 = vmatprep.subr.bf16.mxu1 %v3287_v49 }
 0x36b   : > { %v3119_v60 = vpop.eup %3118 }
 0x36c   : > { %2700 = vmatmul.mubr.msk.f32.gmra.mrb[6].mxu1 %vm235_vm7, %v497_v45  ;;  %v1320_v61 = vmul.f32 %v3119_v60, %v3493_v1  ;;  %v1322_v41 = vmul.f32 %v3119_v60, %v3499_v3  ;;  %v1323_v62 = vmul.f32 %v3119_v60, %v3514_v7  ;;  %v1324_v63 = vmul.f32 %v3119_v60, %v3521_v9  ;;  %v3121_v32 = vpop.eup %3120 }
 0x36d   : > { %2880 = vmatpush3.bf16.msra.mxu1 %v2879_v48  ;;  %2718 = vmatprep.mubr.msk.f32.mxu1 %vm3289_vm10, %v3290_v25  ;;  %v1325_v20 = vmul.f32 %v3119_v60, %v3524_v10  ;;  %v1350_v33 = vmul.f32 %v3121_v32, %v1348_v22  ;;  %v1319_v43 = vmul.f32 %v3119_v60, %v3490_v0 }
 0x36e   : > { %1377 = vrot.lane.b32.xlu1 %v1320_v61, %s3296_s29  ;;  %v1321_v45 = vmul.f32 %v3119_v60, %v3496_v2  ;;  %v1326_v48 = vmul.f32 %v3119_v60, %v3529_v12 }
 0x36f   : > { %v1352_v4 = vsel %vm1351_vm4, %v1348_v22, %v1350_v33 }
 0x370   : > { %v1355_v39 = vsel %vm1353_vm5, %v1354_v5, %v1352_v4 }
 0x371   : > { %v1356_v28 = vmax.f32 %v1355_v39, 1e-12 }
 0x372   : > { %1381 = vrot.lane.b32.xlu1 %v1322_v41, %s3296_s29 }
 0x373   : > { %3122 = vrcp.f32 %v1356_v28 }
 0x374   : > { %v751_v13 = vpop.trf.xlu1 }
 0x375   : > { %2719 = vmatmul.mubr.msk.f32.vlgmr.msra.gmra.mrb[8].mxu1 %vm379_vm15, %v751_v13 }
 0x376   : > { %1383 = vrot.lane.b32.xlu1 %v1323_v62, %s3296_s29 }
 0x37a   : > { %1385 = vrot.lane.b32.xlu1 %v1324_v63, %s3296_s29 }
 0x37d   : > { %v3123_v6 = vpop.eup %3122 }
 0x37e   : > { %1387 = vrot.lane.b32.xlu1 %v1325_v20, %s3296_s29  ;;  %v1361_v44 = vmul.f32 %v3123_v6, %v3496_v2  ;;  %v1362_v46 = vmul.f32 %v3123_v6, %v3499_v3  ;;  %v1359_v13 = vmul.f32 %v3123_v6, %v3490_v0  ;;  %v1360_v50 = vmul.f32 %v3123_v6, %v3493_v1  ;;  %v3834_v20 = vld [vmem:[%s3479_s25 + $0x18] sm:$0xff] }
 0x37f   : > { %v1365_v40 = vmul.f32 %v3123_v6, %v3524_v10  ;;  %v1366_v51 = vmul.f32 %v3123_v6, %v3529_v12  ;;  %v1363_v62 = vmul.f32 %v3123_v6, %v3514_v7  ;;  %v1364_v63 = vmul.f32 %v3123_v6, %v3521_v9 }
 0x380   : > { %v3058_v8 = vpack.i.bf16 %v1362_v46, %v1361_v44  ;;  %v3053_v3 = vpack.i.bf16 %v1360_v50, %v1359_v13  ;;  %v1846_v50 = vrot.slane %v3659_v23, 4 }
 0x381   : > { %v3068_v52 = vpack.i.bf16 %v1366_v51, %v1365_v40  ;;  %v3063_v11 = vpack.i.bf16 %v1364_v63, %v1363_v62  ;;  %v3880_v62 = vld [vmem:[%s3479_s25 + $0x28] sm:$0xff] }
 0x382   : > { %888 = vrot.lane.b32.xlu1 %v3490_v0, %s3297_s30 }
 0x386   : > { %890 = vrot.lane.b32.xlu1 %v3493_v1, %s3297_s30 }
 0x38a   : > { %3059 = vrot.lane.b32.xlu1 %v3058_v8, %s3298_s4 }
 0x38e   : > { %896 = vrot.lane.b32.xlu1 %v3514_v7, %s3297_s30 }
 0x392   : > { %898 = vrot.lane.b32.xlu1 %v3521_v9, %s3297_s30 }
 0x396   : > { %3069 = vrot.lane.b32.xlu1 %v3068_v52, %s3298_s4 }
 0x3e0   : > { %v1378_v0 = vpop.permute.xlu1 %1377 }
 0x3e4   : > { %v1382_v1 = vpop.permute.xlu1 %1381 }
 0x3e8   : > { %v1384_v54 = vpop.permute.xlu1 %1383 }
 0x3ec   : > { %v1386_v55 = vpop.permute.xlu1 %1385 }
 0x3f0   : > { %v1388_v56 = vpop.permute.xlu1 %1387 }
 0x3f4   : > { %v889_v57 = vpop.permute.xlu1 %888 }
 0x3f5   : > { %2723 = vmatprep.mubr.msk.f32.mxu0 %vm235_vm7, %v889_v57 }
 0x3f8   : > { %v891_v15 = vpop.permute.xlu1 %890 }
 0x3fc   : > { %v3060_v19 = vpop.permute.xlu1 %3059 }
 0x400   : > { %v897_v32 = vpop.permute.xlu1 %896 }
 0x433   : > { %v3791_v21 = vpop.f32.mrb[0].mxu1 }
 0x434   : > { %v3793_v24 = vpop.f32.mrb[1].mxu1 }
 0x437   : > { %v3795_v26 = vpop.f32.mrb[2].mxu1 }
 0x438   : > { %v3797_v27 = vpop.f32.mrb[3].mxu1 }
 0x43b   : > { %v3799_v29 = vpop.f32.mrb[4].mxu1 }
 0x43c   : > { %v3801_v30 = vpop.f32.mrb[5].mxu1 }
 0x43f   : > { %v3803_v31 = vpop.f32.mrb[6].mxu1 }
 0x440   : > { %v3805_v53 = vpop.f32.mrb[7].mxu1 }
 0x448   : > { %v868_v35 = vpop.f32.mrb[8].mxu1 }
 0x449   : > { %v876_v36 = vmul.f32 %v874_v34, %v868_v35  ;;  %v2720_v37 = vpop.f32.mrb[9].mxu1 }
 0x44a   : > { %v3061_v37 = vunpack.i.l.bf16 %v3060_v19 }
 0x44b   : > { %v877_v38 = vsel %vm235_vm7, %v876_v36, -inf }
 0x44c   : > { %878 = vmax.xlane.f32.xlu0 %v877_v38 }
 0x462   : > { %1375 = vrot.lane.b32.xlu0 %v1319_v43, %s3296_s29 }
 0x466   : > { %1379 = vrot.lane.b32.xlu0 %v1321_v45, %s3296_s29 }
 0x46a   : > { %1389 = vrot.lane.b32.xlu0 %v1326_v48, %s3296_s29 }
 0x46e   : > { %3054 = vrot.lane.b32.xlu0 %v3053_v3, %s3298_s4  ;;  %v1847_v3 = vadd.f32 %v1846_v50, %v3659_v23 }
 0x470   : > { %v1848_v40 = vrot.slane %v1847_v3, 2 }
 0x472   : > { %892 = vrot.lane.b32.xlu0 %v3496_v2, %s3297_s30  ;;  %v1849_v51 = vadd.f32 %v1848_v40, %v1847_v3 }
 0x474   : > { %v1850_v52 = vrot.slane %v1849_v51, 1 }
 0x4d9   : > { %v879_v17 = vpop.xlane.xlu0 %878 }
 0x4da   : > { %v880_v58 = vsub.f32 %v876_v36, %v879_v17  ;;  %v3062_v36 = vunpack.i.h.bf16 %v3060_v19 }
 0x4dc   : > { %v881_v59 = vmul.f32 1.442695, %v880_v58  ;;  %v2885_v28 = vpack.c.bf16 %v3062_v36, %v3061_v37 }
 0x4dd   : > { %v1376_v18 = vpop.permute.xlu0 %1375 }
 0x4de   : > { %3124 = vpow2.f32 %v881_v59  ;;  %1399 = vxpose.xlu1.b32.start [1/8] (short) (narrow) %v1376_v18, 8  ;;  %v3865_v18 = vld [vmem:[%s3479_s25 + $0x8] sm:$0xff] }
 0x4e1   : > { %v1380_v60 = vpop.permute.xlu0 %1379 }
 0x4e2   : > { %1400 = vxpose.xlu1.b32.cont [2/8] (short) (narrow) %v1378_v0, 8  ;;  %v1851_v0 = vadd.f32 %v1850_v52, %v1849_v51 }
 0x4e4   : > { %vm1854_vm6 = vcmp.eq.f32.partialorder %v1851_v0, inf  ;;  %v1857_v57 = vand.u32 2147483648, %v1851_v0  ;;  %vm1856_vm8 = vcmp.eq.f32.partialorder %v1851_v0, 0.0 }
 0x4e5   : > { %v1390_v41 = vpop.permute.xlu0 %1389 }
 0x4e6   : > { %1401 = vxpose.xlu1.b32.cont [3/8] (short) (narrow) %v1380_v60, 8 }
 0x4e8   : > { %v3125_v61 = vpop.eup %3124 }
 0x4e9   : > { %v883_v2 = vsel %vm235_vm7, %v3125_v61, 0.0  ;;  %v3055_v7 = vpop.permute.xlu0 %3054 }
 0x4ea   : > { %884 = vadd.xlane.f32.xlu0 %v883_v2  ;;  %1402 = vxpose.xlu1.b32.cont [4/8] (short) (narrow) %v1382_v1, 8  ;;  %v3057_v5 = vunpack.i.h.bf16 %v3055_v7  ;;  %v3056_v35 = vunpack.i.l.bf16 %v3055_v7  ;;  %v1028_v1 = vld [vmem:[#allocation6 + $0x8] sm:$0xff]  ;;  %v3874_v2 = vld [vmem:[%s3479_s25 + $0x20] sm:$0xff]  ;;  %v3892_v7 = vld [vmem:[%s3479_s25 + $0x38] sm:$0xff] }
 0x4eb   : > { %2735 = vmatprep.subr.mxu1 %v1028_v1 }
 0x4ec   : > { %v2882_v4 = vpack.c.bf16 %v3057_v5, %v3056_v35  ;;  %2736 = vmatpush3.msra.mxu1 %v1028_v1 }
 0x4ed   : > { %v893_v9 = vpop.permute.xlu0 %892 }
 0x4ee   : > { %1403 = vxpose.xlu1.b32.cont [5/8] (short) (narrow) %v1384_v54, 8 }
 0x4f2   : > { %1404 = vxpose.xlu1.b32.cont [6/8] (short) (narrow) %v1386_v55, 8  ;;  %v622_v55 = vld [vmem:[#allocation6] sm:$0xff] }
 0x4f3   : > { %2749 = vmatprep.subr.mxu1 %v622_v55 }
 0x4f6   : > { %1405 = vxpose.xlu1.b32.cont [7/8] (short) (narrow) %v1388_v56, 8 }
 0x4fa   : > { %1406 = vxpose.xlu1.b32.end [8/8] (short) (narrow) %v1390_v41, 8 }
 0x500   : > { %894 = vrot.lane.b32.xlu0 %v3834_v20, %s3297_s30 }
 0x504   : > { %3064 = vrot.lane.b32.xlu0 %v3063_v11, %s3298_s4  ;;  %v3886_v11 = vld [vmem:[%s3479_s25 + $0x30] sm:$0xff] }
 0x508   : > { %900 = vrot.lane.b32.xlu0 %v3524_v10, %s3297_s30 }
 0x50c   : > { %902 = vrot.lane.b32.xlu0 %v3529_v12, %s3297_s30  ;;  %v899_v12 = vpop.permute.xlu1 %898 }
 0x510   : > { %1537 = vperm.xlu0 %3073, %v3698_v42   ;;  %v3070_v43 = vpop.permute.xlu1 %3069 }
 0x511   : > { %v3072_v46 = vunpack.i.h.bf16 %v3070_v43  ;;  %v3071_v8 = vunpack.i.l.bf16 %v3070_v43 }
 0x513   : > { %v2891_v48 = vpack.c.bf16 %v3072_v46, %v3071_v8  ;;  %v3931_v8 = vld [vmem:[%s3479_s25 + $0x10] sm:$0xff] }
 0x55e   : > { %v1415_v13 = vpop.trf.xlu1 }
 0x577   : > { %v885_v16 = vpop.xlane.xlu0 %884 }
 0x578   : > { %3126 = vrcp.f32 %v885_v16 }
 0x579   : > { %3128 = vrsqrt.f32 %v1851_v0 }
 0x57b   : > { %v895_v22 = vpop.permute.xlu0 %894 }
 0x57f   : > { %v3065_v10 = vpop.permute.xlu0 %3064 }
 0x580   : > { %v3067_v38 = vunpack.i.h.bf16 %v3065_v10  ;;  %v3066_v39 = vunpack.i.l.bf16 %v3065_v10 }
 0x582   : > { %v3127_v33 = vpop.eup %3126  ;;  %v2888_v44 = vpack.c.bf16 %v3067_v38, %v3066_v39 }
 0x583   : > { %v887_v34 = vmul.f32 %v3127_v33, %v3125_v61  ;;  %v901_v6 = vpop.permute.xlu0 %900  ;;  %v3129_v54 = vpop.eup %3128 }
 0x584   : > { %v1853_v56 = vmul.f32 %v3129_v54, %v1851_v0 }
 0x585   : > { %2721 = vmatprep.subr.msk.mxu0 %vm235_vm7, %v887_v34 }
 0x586   : > { %2722 = vmatpush3.xpose.msk.msra.mxu0 %vm235_vm7, %v887_v34  ;;  %v1855_v17 = vsel %vm1854_vm6, %v1851_v0, %v1853_v56 }
 0x587   : > { %2881 = vmatprep.subr.bf16.mxu0 %v3287_v49  ;;  %v903_v45 = vpop.permute.xlu0 %902  ;;  %v1858_v23 = vsel %vm1856_vm8, %v1857_v57, %v1855_v17 }
 0x588   : > { %v1859_v58 = vmax.f32 %v1858_v23, 1e-12 }
 0x589   : > { %2724 = vmatmul.mubr.msk.f32.vlgmr.msra.gmra.mrb[2].mxu0 %vm235_vm7, %v891_v15  ;;  %v1886_v15 = vrot.slane %v3677_v47, 4 }
 0x58a   : > { %2726 = vmatprep.mubr.msk.f32.mxu0 %vm235_vm7, %v893_v9  ;;  %2883 = vmatpush3.bf16.msra.mxu0 %v2882_v4  ;;  %3130 = vrcp.f32 %v1859_v58 }
 0x58b   : > { %2884 = vmatprep.subr.bf16.mxu0 %v3287_v49  ;;  %v1887_v16 = vadd.f32 %v1886_v15, %v3677_v47 }
 0x58d   : > { %2727 = vmatmul.mubr.msk.f32.gmra.mrb[4].mxu0 %vm235_vm7, %v895_v22  ;;  %v1888_v19 = vrot.slane %v1887_v16, 2 }
 0x58e   : > { %2729 = vmatprep.mubr.msk.f32.mxu0 %vm235_vm7, %v897_v32  ;;  %2886 = vmatpush3.bf16.msra.mxu0 %v2885_v28 }
 0x58f   : > { %2887 = vmatprep.subr.bf16.mxu0 %v3287_v49  ;;  %v1889_v22 = vadd.f32 %v1888_v19, %v1887_v16  ;;  %v1538_v37 = vpop.permute.xlu0 %1537 }
 0x591   : > { %2730 = vmatmul.mubr.msk.f32.gmra.mrb[6].mxu0 %vm235_vm7, %v899_v12  ;;  %v1890_v34 = vrot.slane %v1889_v22, 1 }
 0x592   : > { %2732 = vmatprep.mubr.msk.f32.mxu0 %vm235_vm7, %v901_v6  ;;  %2889 = vmatpush3.bf16.msra.mxu0 %v2888_v44 }
 0x593   : > { %2890 = vmatprep.subr.bf16.mxu0 %v3287_v49  ;;  %v1891_v10 = vadd.f32 %v1890_v34, %v1889_v22 }
 0x594   : > { %v3862_v59 = vpop.eup %3130 }
 0x595   : > { %2733 = vmatmul.mubr.msk.f32.gmra.mrb[8].mxu0 %vm235_vm7, %v903_v45  ;;  %v1863_v60 = vmul.f32 %v3865_v18, %v3862_v59  ;;  %v1865_v61 = vmul.f32 %v3834_v20, %v3862_v59  ;;  %v1866_v41 = vmul.f32 %v3874_v2, %v3862_v59  ;;  %v1867_v63 = vmul.f32 %v3880_v62, %v3862_v59 }
 0x596   : > { %2892 = vmatpush3.bf16.msra.mxu0 %v2891_v48  ;;  %2779 = vmatprep.mubr.msk.f32.mxu0 %vm3289_vm10, %v3290_v25  ;;  %v1868_v14 = vmul.f32 %v3886_v11, %v3862_v59  ;;  %v1869_v9 = vmul.f32 %v3892_v7, %v3862_v59  ;;  %3132 = vrsqrt.f32 %v1891_v10  ;;  %vm1894_vm9 = vcmp.eq.f32.partialorder %v1891_v10, inf }
 0x597   : > { %1920 = vrot.lane.b32.xlu1 %v1863_v60, %s3300_s5  ;;  %vm1896_vm11 = vcmp.eq.f32.partialorder %v1891_v10, 0.0 }
 0x599   : > { %2780 = vmatmul.mubr.msk.f32.vlgmr.msra.gmra.mrb[10].mxu0 %vm379_vm15, %v1415_v13 }
 0x59b   : > { %1924 = vrot.lane.b32.xlu1 %v1865_v61, %s3300_s5 }
 0x59f   : > { %1926 = vrot.lane.b32.xlu1 %v1866_v41, %s3300_s5 }
 0x5a0   : > { %v3133_v43 = vpop.eup %3132 }
 0x5a1   : > { %v1893_v44 = vmul.f32 %v3133_v43, %v1891_v10 }
 0x5a3   : > { %1928 = vrot.lane.b32.xlu1 %v1867_v63, %s3300_s5  ;;  %v1895_v46 = vsel %vm1894_vm9, %v1891_v10, %v1893_v44  ;;  %v3303_v63 = vmov 3  }
 0x5a4   : > { %3094 = vset.pattern.permute.xlu1 %v3303_v63 }
 0x5a7   : > { %1930 = vrot.lane.b32.xlu1 %v1868_v14, %s3300_s5 }
 0x5ab   : > { %1932 = vrot.lane.b32.xlu1 %v1869_v9, %s3300_s5 }
 0x609   : > { %v1921_v61 = vpop.permute.xlu1 %1920 }
 0x60d   : > { %v1925_v41 = vpop.permute.xlu1 %1924 }
 0x611   : > { %v1927_v14 = vpop.permute.xlu1 %1926 }
 0x615   : > { %v1929_v9 = vpop.permute.xlu1 %1928 }
 0x619   : > { %v1931_v15 = vpop.permute.xlu1 %1930 }
 0x61d   : > { %v1933_v16 = vpop.permute.xlu1 %1932 }
 0x65c   : > { %v2725_v32 = vpop.f32.mrb[2].mxu0 }
 0x65d   : > { %v989_v33 = vpop.f32.mrb[3].mxu0 }
 0x65e   : > { %2737 = vmatprep.mubr.msk.f32.mxu1 %vm235_vm7, %v989_v33 }
 0x65f   : > { %2738 = vmatmul.mubr.msk.f32.vlgmr.msra.gmra.mrb[10].mxu1 %vm235_vm7, %v2725_v32 }
 0x660   : > { %v2728_v5 = vpop.f32.mrb[4].mxu0  ;;  %2750 = vmatpush3.msra.mxu1 %v622_v55 }
 0x661   : > { %v999_v35 = vpop.f32.mrb[5].mxu0 }
 0x662   : > { %2740 = vmatprep.mubr.msk.f32.mxu1 %vm235_vm7, %v999_v35 }
 0x663   : > { %2741 = vmatmul.mubr.msk.f32.gmra.mrb[12].mxu1 %vm235_vm7, %v2728_v5 }
 0x664   : > { %v2731_v12 = vpop.f32.mrb[6].mxu0 }
 0x665   : > { %v1009_v4 = vpop.f32.mrb[7].mxu0 }
 0x666   : > { %2743 = vmatprep.mubr.msk.f32.mxu1 %vm235_vm7, %v1009_v4 }
 0x667   : > { %2744 = vmatmul.mubr.msk.f32.gmra.mrb[14].mxu1 %vm235_vm7, %v2731_v12 }
 0x668   : > { %v2734_v47 = vpop.f32.mrb[8].mxu0 }
 0x669   : > { %v1019_v36 = vpop.f32.mrb[9].mxu0 }
 0x66a   : > { %2746 = vmatprep.mubr.msk.f32.mxu1 %vm235_vm7, %v1019_v36 }
 0x66b   : > { %2747 = vmatmul.mubr.msk.f32.gmra.mrb[16].mxu1 %vm235_vm7, %v2734_v47 }
 0x66c   : > { %2751 = vmatprep.mubr.msk.f32.mxu1 %vm235_vm7, %v3793_v24  ;;  %v1532_v38 = vpop.f32.mrb[10].mxu0  ;;  %v1897_v24 = vand.u32 2147483648, %v1891_v10 }
 0x66d   : > { %v1540_v39 = vmul.f32 %v1538_v37, %v1532_v38  ;;  %v2781_v28 = vpop.f32.mrb[11].mxu0 }
 0x66f   : > { %2752 = vmatmul.mubr.msk.f32.vlgmr.msra.gmra.mrb[10].mxu1 %vm235_vm7, %v3791_v21  ;;  %v1541_v6 = vsel %vm235_vm7, %v1540_v39, -inf  ;;  %v1898_v21 = vsel %vm1896_vm11, %v1897_v24, %v1895_v46 }
 0x670   : > { %2754 = vmatprep.mubr.msk.f32.mxu1 %vm235_vm7, %v3797_v27  ;;  %1542 = vmax.xlane.f32.xlu0 %v1541_v6  ;;  %v1899_v27 = vmax.f32 %v1898_v21, 1e-12 }
 0x672   : > { %3134 = vrcp.f32 %v1899_v27 }
 0x673   : > { %2755 = vmatmul.mubr.msk.f32.gmra.mrb[12].mxu1 %vm235_vm7, %v3795_v26  ;;  %v3925_v26 = vld [vmem:[%s3479_s25] sm:$0xff] }
 0x674   : > { %2757 = vmatprep.mubr.msk.f32.mxu1 %vm235_vm7, %v3801_v30  ;;  %v1862_v30 = vmul.f32 %v3925_v26, %v3862_v59 }
 0x677   : > { %2758 = vmatmul.mubr.msk.f32.gmra.mrb[14].mxu1 %vm235_vm7, %v3799_v29  ;;  %v1864_v29 = vmul.f32 %v3931_v8, %v3862_v59 }
 0x678   : > { %2760 = vmatprep.mubr.msk.f32.mxu1 %vm235_vm7, %v3805_v53 }
 0x67b   : > { %2761 = vmatmul.mubr.msk.f32.gmra.mrb[16].mxu1 %vm235_vm7, %v3803_v31 }
 0x67c   : > { %v3135_v53 = vpop.eup %3134 }
 0x67d   : > { %v1904_v31 = vmul.f32 %v3931_v8, %v3135_v53  ;;  %v1905_v45 = vmul.f32 %v3834_v20, %v3135_v53  ;;  %v1902_v48 = vmul.f32 %v3925_v26, %v3135_v53  ;;  %v1903_v13 = vmul.f32 %v3865_v18, %v3135_v53 }
 0x67e   : > { %v1908_v40 = vmul.f32 %v3886_v11, %v3135_v53  ;;  %v1909_v51 = vmul.f32 %v3892_v7, %v3135_v53  ;;  %v1906_v0 = vmul.f32 %v3874_v2, %v3135_v53  ;;  %v1907_v1 = vmul.f32 %v3880_v62, %v3135_v53 }
 0x67f   : > { %v3074_v50 = vpack.i.bf16 %v1903_v13, %v1902_v48  ;;  %v3079_v3 = vpack.i.bf16 %v1905_v45, %v1904_v31  ;;  %v1692_v31 = vld [vmem:[#allocation6 + $0x10] sm:$0xff] }
 0x680   : > { %v3089_v52 = vpack.i.bf16 %v1909_v51, %v1908_v40  ;;  %v3084_v54 = vpack.i.bf16 %v1907_v1, %v1906_v0  ;;  %2796 = vmatprep.subr.mxu1 %v1692_v31 }
 0x681   : > { %3075 = vrot.lane.b32.xlu1 %v3074_v50, %s3302_s18  ;;  %2797 = vmatpush3.msra.mxu1 %v1692_v31 }
 0x685   : > { %1556 = vrot.lane.b32.xlu1 %v3931_v8, %s3301_s15 }
 0x686   : > { %1918 = vrot.lane.b32.xlu0 %v1862_v30, %s3300_s5 }
 0x689   : > { %1558 = vrot.lane.b32.xlu1 %v3834_v20, %s3301_s15 }
 0x68a   : > { %1922 = vrot.lane.b32.xlu0 %v1864_v29, %s3300_s5 }
 0x68d   : > { %3085 = vrot.lane.b32.xlu1 %v3084_v54, %s3302_s18 }
 0x68e   : > { %1552 = vrot.lane.b32.xlu0 %v3925_v26, %s3301_s15 }
 0x691   : > { %1564 = vrot.lane.b32.xlu1 %v3886_v11, %s3301_s15 }
 0x692   : > { %1554 = vrot.lane.b32.xlu0 %v3865_v18, %s3301_s15 }
 0x695   : > { %1566 = vrot.lane.b32.xlu1 %v3892_v7, %s3301_s15 }
 0x696   : > { %3080 = vrot.lane.b32.xlu0 %v3079_v3, %s3302_s18 }
 0x699   : > { %2080 = vperm.xlu1 %3094, %v3698_v42  }
 0x69a   : > { %1560 = vrot.lane.b32.xlu0 %v3874_v2, %s3301_s15 }
 0x69e   : > { %1562 = vrot.lane.b32.xlu0 %v3880_v62, %s3301_s15 }
 0x6a2   : > { %3090 = vrot.lane.b32.xlu0 %v3089_v52, %s3302_s18 }
 0x6f3   : > { %v3076_v5 = vpop.permute.xlu1 %3075 }
 0x6f4   : > { %v3078_v47 = vunpack.i.h.bf16 %v3076_v5  ;;  %v3077_v36 = vunpack.i.l.bf16 %v3076_v5 }
 0x6f6   : > { %v2894_v28 = vpack.c.bf16 %v3078_v47, %v3077_v36 }
 0x6f7   : > { %v1557_v42 = vpop.permute.xlu1 %1556 }
 0x6fb   : > { %v1559_v10 = vpop.permute.xlu1 %1558 }
 0x6fd   : > { %v1543_v55 = vpop.xlane.xlu0 %1542 }
 0x6fe   : > { %v1544_v56 = vsub.f32 %v1540_v39, %v1543_v55 }
 0x6ff   : > { %v3086_v37 = vpop.permute.xlu1 %3085 }
 0x700   : > { %v1545_v57 = vmul.f32 1.442695, %v1544_v56  ;;  %v3088_v6 = vunpack.i.h.bf16 %v3086_v37  ;;  %v3087_v43 = vunpack.i.l.bf16 %v3086_v37 }
 0x701   : > { %v1919_v17 = vpop.permute.xlu0 %1918 }
 0x702   : > { %3136 = vpow2.f32 %v1545_v57  ;;  %v2900_v46 = vpack.c.bf16 %v3088_v6, %v3087_v43 }
 0x703   : > { %v1565_v24 = vpop.permute.xlu1 %1564 }
 0x705   : > { %v1923_v23 = vpop.permute.xlu0 %1922 }
 0x707   : > { %v1567_v30 = vpop.permute.xlu1 %1566 }
 0x709   : > { %v1553_v58 = vpop.permute.xlu0 %1552 }
 0x70a   : > { %2784 = vmatprep.mubr.msk.f32.mxu0 %vm235_vm7, %v1553_v58 }
 0x70c   : > { %v3137_v59 = vpop.eup %3136 }
 0x70d   : > { %v1547_v60 = vsel %vm235_vm7, %v3137_v59, 0.0  ;;  %v1555_v19 = vpop.permute.xlu0 %1554 }
 0x70e   : > { %1548 = vadd.xlane.f32.xlu0 %v1547_v60 }
 0x711   : > { %v3081_v22 = vpop.permute.xlu0 %3080 }
 0x712   : > { %v3083_v38 = vunpack.i.h.bf16 %v3081_v22  ;;  %v3082_v39 = vunpack.i.l.bf16 %v3081_v22 }
 0x714   : > { %v2897_v44 = vpack.c.bf16 %v3083_v38, %v3082_v39 }
 0x715   : > { %v1561_v32 = vpop.permute.xlu0 %1560 }
 0x718   : > { %v2081_v40 = vpop.permute.xlu1 %2080 }
 0x719   : > { %v1563_v33 = vpop.permute.xlu0 %1562 }
 0x71d   : > { %v3091_v34 = vpop.permute.xlu0 %3090 }
 0x71e   : > { %v3093_v21 = vunpack.i.h.bf16 %v3091_v34  ;;  %v3092_v27 = vunpack.i.l.bf16 %v3091_v34 }
 0x720   : > { %v2903_v29 = vpack.c.bf16 %v3093_v21, %v3092_v27 }
 0x73b   : > { %1942 = vxpose.xlu0.b32.start [1/8] (short) (narrow) %v1919_v17, 8 }
 0x73f   : > { %1943 = vxpose.xlu0.b32.cont [2/8] (short) (narrow) %v1921_v61, 8 }
 0x743   : > { %1944 = vxpose.xlu0.b32.cont [3/8] (short) (narrow) %v1923_v23, 8 }
 0x747   : > { %1945 = vxpose.xlu0.b32.cont [4/8] (short) (narrow) %v1925_v41, 8 }
 0x74b   : > { %1946 = vxpose.xlu0.b32.cont [5/8] (short) (narrow) %v1927_v14, 8 }
 0x74f   : > { %1947 = vxpose.xlu0.b32.cont [6/8] (short) (narrow) %v1929_v9, 8 }
 0x753   : > { %1948 = vxpose.xlu0.b32.cont [7/8] (short) (narrow) %v1931_v15, 8 }
 0x757   : > { %1949 = vxpose.xlu0.b32.end [8/8] (short) (narrow) %v1933_v16, 8 }
 0x780   : > { %3095 = vset.pattern.permute.xlu0 %v3303_v63 }
 0x781   : > { %2097 = vrot.lane.b32.xlu0 %v3865_v18, %s3304_s24 }
 0x79b   : > { %v1549_v35 = vpop.xlane.xlu0 %1548 }
 0x79c   : > { %3138 = vrcp.f32 %v1549_v35 }
 0x7a6   : > { %v3139_v12 = vpop.eup %3138 }
 0x7a7   : > { %v1551_v4 = vmul.f32 %v3139_v12, %v3137_v59 }
 0x7a9   : > { %2782 = vmatprep.subr.msk.mxu0 %vm235_vm7, %v1551_v4 }
 0x7aa   : > { %2783 = vmatpush3.xpose.msk.msra.mxu0 %vm235_vm7, %v1551_v4 }
 0x7ab   : > { %2893 = vmatprep.subr.bf16.mxu0 %v3287_v49 }
 0x7ad   : > { %2785 = vmatmul.mubr.msk.f32.vlgmr.msra.gmra.mrb[12].mxu0 %vm235_vm7, %v1555_v19 }
 0x7ae   : > { %2787 = vmatprep.mubr.msk.f32.mxu0 %vm235_vm7, %v1557_v42  ;;  %2895 = vmatpush3.bf16.msra.mxu0 %v2894_v28 }
 0x7af   : > { %2896 = vmatprep.subr.bf16.mxu0 %v3287_v49 }
 0x7b1   : > { %2788 = vmatmul.mubr.msk.f32.gmra.mrb[14].mxu0 %vm235_vm7, %v1559_v10 }
 0x7b2   : > { %2790 = vmatprep.mubr.msk.f32.mxu0 %vm235_vm7, %v1561_v32  ;;  %2898 = vmatpush3.bf16.msra.mxu0 %v2897_v44 }
 0x7b3   : > { %2899 = vmatprep.subr.bf16.mxu0 %v3287_v49 }
 0x7b5   : > { %2791 = vmatmul.mubr.msk.f32.gmra.mrb[16].mxu0 %vm235_vm7, %v1563_v33 }
 0x7b6   : > { %2793 = vmatprep.mubr.msk.f32.mxu0 %vm235_vm7, %v1565_v24  ;;  %2901 = vmatpush3.bf16.msra.mxu0 %v2900_v46 }
 0x7b7   : > { %2902 = vmatprep.subr.bf16.mxu0 %v3287_v49 }
 0x7b9   : > { %2794 = vmatmul.mubr.msk.f32.gmra.mrb[18].mxu0 %vm235_vm7, %v1567_v30 }
 0x7ba   : > { %2904 = vmatpush3.bf16.msra.mxu0 %v2903_v29  ;;  %2826 = vmatprep.mubr.msk.f32.mxu0 %vm3289_vm10, %v3290_v25  ;;  %vm2373_vm10 = vcmask 261120  }
 0x7bb   : > { %v1958_v53 = vpop.trf.xlu0 }
 0x7bd   : > { %2827 = vmatmul.mubr.msk.f32.vlgmr.msra.gmra.mrb[20].mxu0 %vm379_vm15, %v1958_v53 }
 0x880   : > { %v2786_v45 = vpop.f32.mrb[12].mxu0 }
 0x881   : > { %v1653_v48 = vpop.f32.mrb[13].mxu0 }
 0x882   : > { %2798 = vmatprep.mubr.msk.f32.mxu1 %vm235_vm7, %v1653_v48 }
 0x883   : > { %2799 = vmatmul.mubr.msk.f32.vlgmr.msra.gmra.mrb[10].mxu1 %vm235_vm7, %v2786_v45 }
 0x884   : > { %v2789_v49 = vpop.f32.mrb[14].mxu0 }
 0x885   : > { %v1663_v13 = vpop.f32.mrb[15].mxu0 }
 0x886   : > { %2801 = vmatprep.mubr.msk.f32.mxu1 %vm235_vm7, %v1663_v13 }
 0x887   : > { %2802 = vmatmul.mubr.msk.f32.gmra.mrb[12].mxu1 %vm235_vm7, %v2789_v49 }
 0x888   : > { %v2792_v25 = vpop.f32.mrb[16].mxu0 }
 0x889   : > { %v1673_v50 = vpop.f32.mrb[17].mxu0 }
 0x88a   : > { %2804 = vmatprep.mubr.msk.f32.mxu1 %vm235_vm7, %v1673_v50 }
 0x88b   : > { %2805 = vmatmul.mubr.msk.f32.gmra.mrb[14].mxu1 %vm235_vm7, %v2792_v25 }
 0x88c   : > { %v2795_v3 = vpop.f32.mrb[18].mxu0 }
 0x88d   : > { %v1683_v18 = vpop.f32.mrb[19].mxu0 }
 0x88e   : > { %2807 = vmatprep.mubr.msk.f32.mxu1 %vm235_vm7, %v1683_v18 }
 0x88f   : > { %2808 = vmatmul.mubr.msk.f32.gmra.mrb[16].mxu1 %vm235_vm7, %v2795_v3 }
 0x890   : > { %v2075_v51 = vpop.f32.mrb[20].mxu0 }
 0x891   : > { %v2083_v52 = vmul.f32 %v2081_v40, %v2075_v51  ;;  %v2828_v0 = vpop.f32.mrb[21].mxu0 }
 0x893   : > { %v2084_v1 = vsel %vm235_vm7, %v2083_v52, -inf }
 0x894   : > { %2085 = vmax.xlane.f32.xlu1 %v2084_v1 }
 0x8a5   : > { %2095 = vrot.lane.b32.xlu1 %v3925_v26, %s3304_s24  ;;  %v2235_v26 = vld [vmem:[#allocation6 + $0x18] sm:$0xff] }
 0x8a6   : > { %2905 = vmatprep.subr.mxu1 %v2235_v26 }
 0x8a7   : > { %2906 = vmatpush3.msra.mxu1 %v2235_v26 }
 0x8a9   : > { %2099 = vrot.lane.b32.xlu1 %v3931_v8, %s3304_s24 }
 0x8ad   : > { %2101 = vrot.lane.b32.xlu1 %v3834_v20, %s3304_s24 }
 0x8b1   : > { %2103 = vrot.lane.b32.xlu1 %v3874_v2, %s3304_s24 }
 0x921   : > { %v2086_v54 = vpop.xlane.xlu1 %2085 }
 0x922   : > { %v2087_v55 = vsub.f32 %v2083_v52, %v2086_v54 }
 0x924   : > { %v2088_v56 = vmul.f32 1.442695, %v2087_v55 }
 0x925   : > { %v2096_v57 = vpop.permute.xlu1 %2095 }
 0x926   : > { %3140 = vpow2.f32 %v2088_v56  ;;  %2831 = vmatprep.mubr.msk.f32.mxu0 %vm235_vm7, %v2096_v57 }
 0x929   : > { %v2100_v8 = vpop.permute.xlu1 %2099 }
 0x92d   : > { %v2102_v58 = vpop.permute.xlu1 %2101 }
 0x930   : > { %v3141_v17 = vpop.eup %3140 }
 0x931   : > { %v2090_v23 = vsel %vm235_vm7, %v3141_v17, 0.0  ;;  %v2104_v59 = vpop.permute.xlu1 %2103 }
 0x932   : > { %2091 = vadd.xlane.f32.xlu1 %v2090_v23 }
 0x943   : > { %2105 = vrot.lane.b32.xlu1 %v3880_v62, %s3304_s24  ;;  %v2098_v62 = vpop.permute.xlu0 %2097 }
 0x947   : > { %2107 = vrot.lane.b32.xlu1 %v3886_v11, %s3304_s24 }
 0x94b   : > { %2109 = vrot.lane.b32.xlu1 %v3892_v7, %s3304_s24 }
 0x956   : > { %v2800_v20 = vpop.f32.mrb[10].mxu1 }
 0x957   : > { %v1783_v2 = vpop.f32.mrb[11].mxu1 }
 0x9bf   : > { %v2092_v60 = vpop.xlane.xlu1 %2091 }
 0x9c0   : > { %3142 = vrcp.f32 %v2092_v60 }
 0x9c3   : > { %v2106_v11 = vpop.permute.xlu1 %2105 }
 0x9c7   : > { %v2108_v7 = vpop.permute.xlu1 %2107 }
 0x9ca   : > { %v3143_v61 = vpop.eup %3142 }
 0x9cb   : > { %v2094_v41 = vmul.f32 %v3143_v61, %v3141_v17  ;;  %v2110_v63 = vpop.permute.xlu1 %2109 }
 0x9cd   : > { %2829 = vmatprep.subr.msk.mxu0 %vm235_vm7, %v2094_v41 }
 0x9ce   : > { %2830 = vmatpush3.xpose.msk.msra.mxu0 %vm235_vm7, %v2094_v41 }
 0x9cf   : > { %2843 = vmatprep.subr.mxu0 %v2235_v26 }
 0x9d1   : > { %2832 = vmatmul.mubr.msk.f32.vlgmr.msra.gmra.mrb[22].mxu0 %vm235_vm7, %v2098_v62 }
 0x9d2   : > { %2834 = vmatprep.mubr.msk.f32.mxu0 %vm235_vm7, %v2100_v8  ;;  %2844 = vmatpush3.msra.mxu0 %v2235_v26 }
 0x9d5   : > { %2835 = vmatmul.mubr.msk.f32.gmra.mrb[24].mxu0 %vm235_vm7, %v2102_v58 }
 0x9d6   : > { %2837 = vmatprep.mubr.msk.f32.mxu0 %vm235_vm7, %v2104_v59 }
 0x9d9   : > { %2838 = vmatmul.mubr.msk.f32.gmra.mrb[26].mxu0 %vm235_vm7, %v2106_v11 }
 0x9da   : > { %2840 = vmatprep.mubr.msk.f32.mxu0 %vm235_vm7, %v2108_v7 }
 0x9dd   : > { %2841 = vmatmul.mubr.msk.f32.gmra.mrb[28].mxu0 %vm235_vm7, %v2110_v63 }
 0xaa4   : > { %v2833_v14 = vpop.f32.mrb[22].mxu0 }
 0xaa5   : > { %v2196_v9 = vpop.f32.mrb[23].mxu0 }
 0xaa6   : > { %2845 = vmatprep.mubr.msk.f32.mxu0 %vm235_vm7, %v2196_v9 }
 0xaa7   : > { %2846 = vmatmul.mubr.msk.f32.vlgmr.msra.gmra.mrb[30].mxu0 %vm235_vm7, %v2833_v14 }
 0xaa8   : > { %v2836_v15 = vpop.f32.mrb[24].mxu0 }
 0xaa9   : > { %v2206_v16 = vpop.f32.mrb[25].mxu0 }
 0xaaa   : > { %2848 = vmatprep.mubr.msk.f32.mxu1 %vm235_vm7, %v2206_v16 }
 0xaab   : > { %2849 = vmatmul.mubr.msk.f32.vlgmr.msra.gmra.mrb[12].mxu1 %vm235_vm7, %v2836_v15 }
 0xaac   : > { %v2839_v19 = vpop.f32.mrb[26].mxu0 }
 0xaad   : > { %v2216_v22 = vpop.f32.mrb[27].mxu0 }
 0xaae   : > { %2851 = vmatprep.mubr.msk.f32.mxu1 %vm235_vm7, %v2216_v22 }
 0xaaf   : > { %2852 = vmatmul.mubr.msk.f32.gmra.mrb[14].mxu1 %vm235_vm7, %v2839_v19 }
 0xab0   : > { %v2842_v32 = vpop.f32.mrb[28].mxu0 }
 0xab1   : > { %v2226_v33 = vpop.f32.mrb[29].mxu0 }
 0xab2   : > { %2854 = vmatprep.mubr.msk.f32.mxu1 %vm235_vm7, %v2226_v33 }
 0xab3   : > { %2855 = vmatmul.mubr.msk.f32.gmra.mrb[16].mxu1 %vm235_vm7, %v2842_v32 }
 0xb7a   : > { %v2847_v34 = vpop.f32.mrb[30].mxu0 }
 0xb7b   : > { %v2907_v5 = vadd.f32 %v2847_v34, %v2800_v20  ;;  %v2326_v35 = vpop.f32.mrb[31].mxu0 }
 0xb7c   : > { %v2908_v42 = vadd.f32 %v2326_v35, %v1783_v2 }
 0xb7d   : > { %2375 = vst.msk [vmem:[%s217_s10 + $0x8] sm:$0xff] %vm2373_vm10, %v2907_v5 }
 0xb7e   : > { %2374 = vst.msk [vmem:[%s217_s10] sm:$0xff] %vm2373_vm10, %v2908_v42  ;;  %v2850_v10 = vpop.f32.mrb[12].mxu1 }
 0xb7f   : > { %2377 = vst.msk [vmem:[%s217_s10 + $0x18] sm:$0xff] %vm2373_vm10, %v2850_v10  ;;  %v2336_v12 = vpop.f32.mrb[13].mxu1 }
 0xb80   : > { %2376 = vst.msk [vmem:[%s217_s10 + $0x10] sm:$0xff] %vm2373_vm10, %v2336_v12 }
 0xb82   : > { %v2853_v4 = vpop.f32.mrb[14].mxu1 }
 0xb83   : > { %2379 = vst.msk [vmem:[%s217_s10 + $0x28] sm:$0xff] %vm2373_vm10, %v2853_v4  ;;  %v2346_v47 = vpop.f32.mrb[15].mxu1 }
 0xb84   : > { %2378 = vst.msk [vmem:[%s217_s10 + $0x20] sm:$0xff] %vm2373_vm10, %v2346_v47 }
 0xb86   : > { %v2856_v36 = vpop.f32.mrb[16].mxu1 }
 0xb87   : > { %2381 = vst.msk [vmem:[%s217_s10 + $0x38] sm:$0xff] %vm2373_vm10, %v2856_v36  ;;  %v2356_v37 = vpop.f32.mrb[17].mxu1 }
 0xb88   : > { %2380 = vst.msk [vmem:[%s217_s10 + $0x30] sm:$0xff] %vm2373_vm10, %v2356_v37 }
 0xb89 PF: > { %p14_p7 = scmp.ge.s32.totalorder %s3347_s17, 4   ;;  %s4060_s12 = smov %s3272_s13 }
 0xb8a   : > { %s4061_s13 = smov %s3276_s14  ;;  %s4062_s14 = smov %s3357_s20 }
 0xb8b   : > { %s4063_s15 = smov %s3347_s17  ;;  %16 = sbr.rel (!%p14_p7) target bundleno = 4 (0x4), region = 81 }
 0xb92   :  { %2403 = vsyncpa [#allocation3], 1 }
 0xb93   :  { %2405 = vsyncpa [#allocation3 + $0x1], 1 }
 0xb94   :  { %2406 = vsyncpa [#allocation5], 1 }
 0xb95   :  { %2408 = vsyncpa [#allocation5 + $0x1], 1 }

</bundles_post_ra>
